<compile_context>
chip_gen: v7x
topology: tpu7x:2x2x1
jax: 0.10.0
libtpu: 0.0.40
codegen_flags: <defaults>
</compile_context>

<pallas_src>
import math
from functools import partial

import jax
import jax.numpy as jnp
from jax import lax
from jax.experimental import pallas as pl
from jax.experimental.pallas import tpu as pltpu

NEG_INF = -1e30
LN_EPS = 1e-5


# ----------------------------- shared math helpers -----------------------------

def _layernorm(x, gamma, beta):
    mean = jnp.mean(x, axis=-1, keepdims=True)
    var = jnp.mean((x - mean) ** 2, axis=-1, keepdims=True)
    return (x - mean) * lax.rsqrt(var + LN_EPS) * gamma + beta


def _gelu_tanh(x):
    # TODO(synk): nn.GELU() default is the exact erf GELU; the tanh
    # approximation is used here (and in the in-script reference, so the
    # self-check is apples-to-apples).
    c = math.sqrt(2.0 / math.pi)
    return 0.5 * x * (1.0 + jnp.tanh(c * (x + 0.044715 * x * x * x)))


# --------------------------------- fused kernel ---------------------------------

def dt_fused_kernel(n_heads, n_blocks, hidden_dim, tanh_start,
                    h_ref,
                    elng_ref, elnb_ref,
                    wqkv_ref, bqkv_ref, wo_ref, bo_ref,
                    ln1g_ref, ln1b_ref, w1_ref, b1_ref, w2_ref, b2_ref,
                    ln2g_ref, ln2b_ref,
                    wh_ref, bh_ref,
                    out_ref):
    H = hidden_dim
    D = H // n_heads
    scale = 1.0 / math.sqrt(D)

    x = h_ref[...].astype(jnp.float32)                     # (S, H)
    S = x.shape[0]

    # embed_ln
    x = _layernorm(x, elng_ref[...], elnb_ref[...])

    # causal mask built once, shared by every block / head
    row = lax.broadcasted_iota(jnp.int32, (S, S), 0)
    col = lax.broadcasted_iota(jnp.int32, (S, S), 1)
    causal = row >= col

    for l in range(n_blocks):                              # static unroll over blocks
        wqkv = wqkv_ref[l]                                 # (H, 3H)
        bqkv = bqkv_ref[l]                                 # (1, 3H)
        wo = wo_ref[l]                                     # (H, H)
        bo = bo_ref[l]                                     # (1, H)

        # fused Q|K|V projection: one (S,H) x (H,3H) MXU op
        qkv = jnp.dot(x, wqkv, preferred_element_type=jnp.float32) + bqkv
        q = qkv[:, 0:H] * scale                            # scale folded once on (S, H)
        k = qkv[:, H:2 * H]
        v = qkv[:, 2 * H:3 * H]

        attn = jnp.zeros((S, H), jnp.float32)
        for hd in range(n_heads):                          # static unroll over heads
            lo, hi = hd * D, (hd + 1) * D
            qh = q[:, lo:hi]
            kh = k[:, lo:hi]
            vh = v[:, lo:hi]
            s = jnp.dot(qh, kh.T, preferred_element_type=jnp.float32)
            s = jnp.where(causal, s, NEG_INF)
            m = jnp.max(s, axis=-1, keepdims=True)
            e = jnp.exp(s - m)
            inv = pl.reciprocal(jnp.sum(e, axis=-1, keepdims=True), approx=True)
            p = e * inv
            oh = jnp.dot(p, vh, preferred_element_type=jnp.float32)   # (S, D)
            # accumulate through the matching row-slice of the output projection
            # (avoids a lane-axis concatenate of per-head outputs)
            attn = attn + jnp.dot(oh, wo[lo:hi, :], preferred_element_type=jnp.float32)
        attn = attn + bo

        # post-LN block:  x = ln1(x + attn(x));  x = ln2(x + ff(x))
        x1 = _layernorm(x + attn, ln1g_ref[l], ln1b_ref[l])

        ff = jnp.dot(x1, w1_ref[l], preferred_element_type=jnp.float32) + b1_ref[l]
        ff = _gelu_tanh(ff)
        ff = jnp.dot(ff, w2_ref[l], preferred_element_type=jnp.float32) + b2_ref[l]

        x = _layernorm(x1 + ff, ln2g_ref[l], ln2b_ref[l])

    # fused prediction heads on ALL token positions; single dense output store.
    # columns: [0]=rtg, [1:1+state_dim]=state, [1+state_dim:]=action (tanh).
    z = jnp.dot(x, wh_ref[...], preferred_element_type=jnp.float32) + bh_ref[...]
    lane = lax.broadcasted_iota(jnp.int32, z.shape, 1)
    out_ref[...] = jnp.where(lane >= tanh_start, jnp.tanh(z), z)


# ------------------------------ pallas wrapper ----------------------------------

def _w_spec(w):
    n = w.ndim
    return pl.BlockSpec(w.shape, lambda b, _n=n: (0,) * _n)


def _pallas_dt_core(h, params, n_heads, tanh_start):
    B, S, H = h.shape
    blk = params["blocks"]
    n_blocks = blk["wqkv"].shape[0]
    elng, elnb = params["embed_ln"]
    wh, bh = params["w_head"], params["b_head"]
    P = wh.shape[1]

    weights = [elng, elnb,
               blk["wqkv"], blk["bqkv"], blk["wo"], blk["bo"],
               blk["ln1g"], blk["ln1b"], blk["w1"], blk["b1"],
               blk["w2"], blk["b2"], blk["ln2g"], blk["ln2b"],
               wh, bh]

    return pl.pallas_call(
        partial(dt_fused_kernel, n_heads, n_blocks, H, tanh_start),
        out_shape=jax.ShapeDtypeStruct((B, S, P), jnp.float32),
        grid=(B,),
        in_specs=[pl.BlockSpec((None, S, H), lambda b: (b, 0, 0))]
                 + [_w_spec(w) for w in weights],
        out_specs=pl.BlockSpec((None, S, P), lambda b: (b, 0, 0)),
        compiler_params=pltpu.CompilerParams(dimension_semantics=("parallel",)),
    )(h, *weights)


# ------------------------------- full forward -----------------------------------

def decision_transformer_forward(params, timesteps, states, actions, rtg, n_heads):
    B, T, state_dim = states.shape
    H = params["embed_timestamp"].shape[-1]
    S = 3 * T
    tanh_start = 1 + state_dim

    # tiny XLA glue: embedding gather + input projections + token interleave
    time_emb = params["embed_timestamp"][timesteps]                    # (B, T, H)
    w, b = params["embed_state"];  state_emb = states @ w + b + time_emb
    w, b = params["embed_action"]; action_emb = actions @ w + b + time_emb
    w, b = params["embed_rtg"];    rtg_emb = rtg @ w + b + time_emb
    # (rtg_t, state_t, action_t) interleave -> (B, 3T, H)
    h = jnp.stack([rtg_emb, state_emb, action_emb], axis=2).reshape(B, S, H)

    # single fused pallas_call: embed_ln + all blocks + fused heads
    out_all = _pallas_dt_core(h, params, n_heads, tanh_start)          # (B, 3T, P)

    # de-interleave: action-token rows feed rtg/state heads, state-token rows feed action head
    rtg_preds = out_all[:, 2::3, 0:1]
    state_preds = out_all[:, 2::3, 1:tanh_start]
    action_preds = out_all[:, 1::3, tanh_start:]
    return state_preds, action_preds, rtg_preds


# --------------------------- pure-JAX reference ---------------------------------

def reference_forward(params, timesteps, states, actions, rtg, n_heads):
    B, T, sd = states.shape
    H = params["embed_timestamp"].shape[-1]
    D = H // n_heads
    S = 3 * T

    def ln(x, g, b):
        m = jnp.mean(x, -1, keepdims=True)
        v = jnp.mean((x - m) ** 2, -1, keepdims=True)
        return (x - m) / jnp.sqrt(v + LN_EPS) * g + b

    time_emb = params["embed_timestamp"][timesteps]
    w, b = params["embed_state"];  se = states @ w + b + time_emb
    w, b = params["embed_action"]; ae = actions @ w + b + time_emb
    w, b = params["embed_rtg"];    re = rtg @ w + b + time_emb
    h = jnp.stack([re, se, ae], axis=2).reshape(B, S, H)
    h = ln(h, *params["embed_ln"])

    mask = jnp.tril(jnp.ones((S, S), dtype=bool))
    blk = params["blocks"]
    for l in range(blk["wqkv"].shape[0]):
        qkv = h @ blk["wqkv"][l] + blk["bqkv"][l]
        q = qkv[..., 0:H].reshape(B, S, n_heads, D).transpose(0, 2, 1, 3)
        k = qkv[..., H:2 * H].reshape(B, S, n_heads, D).transpose(0, 2, 1, 3)
        v = qkv[..., 2 * H:].reshape(B, S, n_heads, D).transpose(0, 2, 1, 3)
        s = jnp.einsum("bhqd,bhkd->bhqk", q, k) / math.sqrt(D)
        s = jnp.where(mask, s, NEG_INF)
        p = jax.nn.softmax(s, axis=-1)
        a = jnp.einsum("bhqk,bhkd->bhqd", p, v).transpose(0, 2, 1, 3).reshape(B, S, H)
        a = a @ blk["wo"][l] + blk["bo"][l]
        x1 = ln(h + a, blk["ln1g"][l], blk["ln1b"][l])
        ff = _gelu_tanh(x1 @ blk["w1"][l] + blk["b1"][l]) @ blk["w2"][l] + blk["b2"][l]
        h = ln(x1 + ff, blk["ln2g"][l], blk["ln2b"][l])

    h4 = h.reshape(B, T, 3, H)
    wh, bh = params["w_head"], params["b_head"]
    rtg_preds = h4[:, :, 2] @ wh[:, 0:1] + bh[:, 0:1]
    state_preds = h4[:, :, 2] @ wh[:, 1:1 + sd] + bh[:, 1:1 + sd]
    action_preds = jnp.tanh(h4[:, :, 1] @ wh[:, 1 + sd:] + bh[:, 1 + sd:])
    return state_preds, action_preds, rtg_preds


# ------------------------------ parameter init -----------------------------------

def init_params(key, state_dim, action_dim, hidden_dim, n_blocks, max_timesteps):
    H = hidden_dim
    P = 1 + state_dim + action_dim
    keys = iter(jax.random.split(key, 32))

    def nrm(shape, s=0.02):
        return jax.random.normal(next(keys), shape, jnp.float32) * s

    # weights stored as (in_features, out_features); Q|K|V and the three heads
    # are pre-fused; per-block weights stacked along a leading n_blocks axis.
    return {
        "embed_timestamp": nrm((max_timesteps, H)),
        "embed_rtg": (nrm((1, H)), nrm((1, H))),
        "embed_state": (nrm((state_dim, H)), nrm((1, H))),
        "embed_action": (nrm((action_dim, H)), nrm((1, H))),
        "embed_ln": (1.0 + nrm((1, H)), nrm((1, H))),
        "w_head": nrm((H, P)),            # columns: rtg | state | action
        "b_head": nrm((1, P)),
        "blocks": {
            "wqkv": nrm((n_blocks, H, 3 * H)),
            "bqkv": nrm((n_blocks, 1, 3 * H)),
            "wo":   nrm((n_blocks, H, H)),
            "bo":   nrm((n_blocks, 1, H)),
            "ln1g": 1.0 + nrm((n_blocks, 1, H)),
            "ln1b": nrm((n_blocks, 1, H)),
            "w1":   nrm((n_blocks, H, 4 * H)),
            "b1":   nrm((n_blocks, 1, 4 * H)),
            "w2":   nrm((n_blocks, 4 * H, H)),
            "b2":   nrm((n_blocks, 1, H)),
            "ln2g": 1.0 + nrm((n_blocks, 1, H)),
            "ln2b": nrm((n_blocks, 1, H)),
        },
    }


# ----------------------------------- main ----------------------------------------

if __name__ == "__main__":
    B, T = 2, 8                       # context_len = 8  -> input seq len = 24
    state_dim, action_dim = 4, 2
    hidden_dim, n_heads, n_blocks = 32, 2, 2
    max_timesteps = 64

    key = jax.random.PRNGKey(0)
    kp, k1, k2, k3, k4 = jax.random.split(key, 5)
    params = init_params(kp, state_dim, action_dim, hidden_dim, n_blocks, max_timesteps)

    timesteps = jax.random.randint(k1, (B, T), 0, max_timesteps)
    states = jax.random.normal(k2, (B, T, state_dim), jnp.float32)
    actions = jax.random.normal(k3, (B, T, action_dim), jnp.float32)
    returns_to_go = jax.random.normal(k4, (B, T, 1), jnp.float32)

    fwd = jax.jit(decision_transformer_forward, static_argnums=(5,))
    outs = fwd(params, timesteps, states, actions, returns_to_go, n_heads)
    outs = jax.block_until_ready(outs)

    refs = reference_forward(params, timesteps, states, actions, returns_to_go, n_heads)
    for name, o, r in zip(("state", "action", "rtg"), outs, refs):
        assert o.shape == r.shape, f"{name} shape {o.shape} vs {r.shape}"
        max_diff = float(jnp.max(jnp.abs(o - r)))
        assert jnp.allclose(o, r, atol=3e-3, rtol=3e-3), \
            f"{name} mismatch vs JAX reference (max |diff| = {max_diff})"

    print("KERNEL_OK")
</pallas_src>

<mosaic_0001>
module attributes {stable_mosaic.version = 11 : i64} {
  func.func @dt_fused_kernel(%arg0: i32, %arg1: memref<1x24x32xf32, #tpu.memory_space<vmem>>, %arg2: memref<1x32xf32, #tpu.memory_space<vmem>>, %arg3: memref<1x32xf32, #tpu.memory_space<vmem>>, %arg4: memref<2x32x96xf32, #tpu.memory_space<vmem>>, %arg5: memref<2x1x96xf32, #tpu.memory_space<vmem>>, %arg6: memref<2x32x32xf32, #tpu.memory_space<vmem>>, %arg7: memref<2x1x32xf32, #tpu.memory_space<vmem>>, %arg8: memref<2x1x32xf32, #tpu.memory_space<vmem>>, %arg9: memref<2x1x32xf32, #tpu.memory_space<vmem>>, %arg10: memref<2x32x128xf32, #tpu.memory_space<vmem>>, %arg11: memref<2x1x128xf32, #tpu.memory_space<vmem>>, %arg12: memref<2x128x32xf32, #tpu.memory_space<vmem>>, %arg13: memref<2x1x32xf32, #tpu.memory_space<vmem>>, %arg14: memref<2x1x32xf32, #tpu.memory_space<vmem>>, %arg15: memref<2x1x32xf32, #tpu.memory_space<vmem>>, %arg16: memref<32x7xf32, #tpu.memory_space<vmem>>, %arg17: memref<1x7xf32, #tpu.memory_space<vmem>>, %arg18: memref<1x24x7xf32, #tpu.memory_space<vmem>>) attributes {dimension_semantics = [#tpu.dimension_semantics<parallel>], iteration_bounds = array<i64: 2>, scalar_prefetch = 0 : i64, scratch_operands = 0 : i64, tpu.core_type = #tpu.core_type<tc>, window_params = [{transform_indices = @transform_0, window_bounds = array<i64: 1, 24, 32>}, {pipeline_mode = #tpu.pipeline_mode<synchronous>, transform_indices = @transform_1, window_bounds = array<i64: 1, 32>}, {pipeline_mode = #tpu.pipeline_mode<synchronous>, transform_indices = @transform_2, window_bounds = array<i64: 1, 32>}, {pipeline_mode = #tpu.pipeline_mode<synchronous>, transform_indices = @transform_3, window_bounds = array<i64: 2, 32, 96>}, {pipeline_mode = #tpu.pipeline_mode<synchronous>, transform_indices = @transform_4, window_bounds = array<i64: 2, 1, 96>}, {pipeline_mode = #tpu.pipeline_mode<synchronous>, transform_indices = @transform_5, window_bounds = array<i64: 2, 32, 32>}, {pipeline_mode = #tpu.pipeline_mode<synchronous>, transform_indices = @transform_6, window_bounds = array<i64: 2, 1, 32>}, {pipeline_mode = #tpu.pipeline_mode<synchronous>, transform_indices = @transform_7, window_bounds = array<i64: 2, 1, 32>}, {pipeline_mode = #tpu.pipeline_mode<synchronous>, transform_indices = @transform_8, window_bounds = array<i64: 2, 1, 32>}, {pipeline_mode = #tpu.pipeline_mode<synchronous>, transform_indices = @transform_9, window_bounds = array<i64: 2, 32, 128>}, {pipeline_mode = #tpu.pipeline_mode<synchronous>, transform_indices = @transform_10, window_bounds = array<i64: 2, 1, 128>}, {pipeline_mode = #tpu.pipeline_mode<synchronous>, transform_indices = @transform_11, window_bounds = array<i64: 2, 128, 32>}, {pipeline_mode = #tpu.pipeline_mode<synchronous>, transform_indices = @transform_12, window_bounds = array<i64: 2, 1, 32>}, {pipeline_mode = #tpu.pipeline_mode<synchronous>, transform_indices = @transform_13, window_bounds = array<i64: 2, 1, 32>}, {pipeline_mode = #tpu.pipeline_mode<synchronous>, transform_indices = @transform_14, window_bounds = array<i64: 2, 1, 32>}, {pipeline_mode = #tpu.pipeline_mode<synchronous>, transform_indices = @transform_15, window_bounds = array<i64: 32, 7>}, {pipeline_mode = #tpu.pipeline_mode<synchronous>, transform_indices = @transform_16, window_bounds = array<i64: 1, 7>}, {transform_indices = @transform_17, window_bounds = array<i64: 1, 24, 7>}]} {
    %c0 = arith.constant 0 : index
    %c0_0 = arith.constant 0 : index
    %c0_1 = arith.constant 0 : index
    %0 = vector.load %arg1[%c0, %c0_0, %c0_1] : memref<1x24x32xf32, #tpu.memory_space<vmem>>, vector<1x24x32xf32>
    %1 = vector.shape_cast %0 : vector<1x24x32xf32> to vector<24x32xf32>
    %c0_2 = arith.constant 0 : index
    %c0_3 = arith.constant 0 : index
    %2 = vector.load %arg2[%c0_2, %c0_3] : memref<1x32xf32, #tpu.memory_space<vmem>>, vector<1x32xf32>
    %c0_4 = arith.constant 0 : index
    %c0_5 = arith.constant 0 : index
    %3 = vector.load %arg3[%c0_4, %c0_5] : memref<1x32xf32, #tpu.memory_space<vmem>>, vector<1x32xf32>
    %cst = arith.constant dense<0.000000e+00> : vector<24xf32>
    %4 = vector.multi_reduction <add>, %1, %cst [1] : vector<24x32xf32> to vector<24xf32>
    %5 = vector.shape_cast %4 : vector<24xf32> to vector<24x1xf32>
    %cst_6 = arith.constant 3.200000e+01 : f32
    %6 = vector.broadcast %cst_6 : f32 to vector<24x1xf32>
    %7 = arith.divf %5, %6 : vector<24x1xf32>
    %8 = vector.broadcast %7 : vector<24x1xf32> to vector<24x32xf32>
    %9 = arith.subf %1, %8 : vector<24x32xf32>
    %10 = arith.mulf %9, %9 : vector<24x32xf32>
    %cst_7 = arith.constant dense<0.000000e+00> : vector<24xf32>
    %11 = vector.multi_reduction <add>, %10, %cst_7 [1] : vector<24x32xf32> to vector<24xf32>
    %12 = vector.shape_cast %11 : vector<24xf32> to vector<24x1xf32>
    %cst_8 = arith.constant 3.200000e+01 : f32
    %13 = vector.broadcast %cst_8 : f32 to vector<24x1xf32>
    %14 = arith.divf %12, %13 : vector<24x1xf32>
    %15 = vector.broadcast %7 : vector<24x1xf32> to vector<24x32xf32>
    %16 = arith.subf %1, %15 : vector<24x32xf32>
    %cst_9 = arith.constant 9.99999974E-6 : f32
    %17 = vector.broadcast %cst_9 : f32 to vector<24x1xf32>
    %18 = arith.addf %14, %17 : vector<24x1xf32>
    %19 = math.rsqrt %18 : vector<24x1xf32>
    %20 = vector.broadcast %19 : vector<24x1xf32> to vector<24x32xf32>
    %21 = arith.mulf %16, %20 : vector<24x32xf32>
    %22 = vector.broadcast %2 : vector<1x32xf32> to vector<24x32xf32>
    %23 = arith.mulf %21, %22 : vector<24x32xf32>
    %24 = vector.broadcast %3 : vector<1x32xf32> to vector<24x32xf32>
    %25 = arith.addf %23, %24 : vector<24x32xf32>
    %26 = tpu.iota {dimensions = array<i32: 0>} : vector<24x24xi32>
    %27 = tpu.iota {dimensions = array<i32: 1>} : vector<24x24xi32>
    %28 = arith.cmpi sge, %26, %27 : vector<24x24xi32>
    %c0_10 = arith.constant 0 : index
    %c0_11 = arith.constant 0 : index
    %c0_12 = arith.constant 0 : index
    %29 = vector.load %arg4[%c0_10, %c0_11, %c0_12] : memref<2x32x96xf32, #tpu.memory_space<vmem>>, vector<1x32x96xf32>
    %30 = vector.shape_cast %29 : vector<1x32x96xf32> to vector<32x96xf32>
    %c0_13 = arith.constant 0 : index
    %c0_14 = arith.constant 0 : index
    %c0_15 = arith.constant 0 : index
    %31 = vector.load %arg5[%c0_13, %c0_14, %c0_15] : memref<2x1x96xf32, #tpu.memory_space<vmem>>, vector<1x1x96xf32>
    %32 = vector.shape_cast %31 : vector<1x1x96xf32> to vector<1x96xf32>
    %c0_16 = arith.constant 0 : index
    %c0_17 = arith.constant 0 : index
    %c0_18 = arith.constant 0 : index
    %33 = vector.load %arg6[%c0_16, %c0_17, %c0_18] : memref<2x32x32xf32, #tpu.memory_space<vmem>>, vector<1x32x32xf32>
    %34 = vector.shape_cast %33 : vector<1x32x32xf32> to vector<32x32xf32>
    %c0_19 = arith.constant 0 : index
    %c0_20 = arith.constant 0 : index
    %c0_21 = arith.constant 0 : index
    %35 = vector.load %arg7[%c0_19, %c0_20, %c0_21] : memref<2x1x32xf32, #tpu.memory_space<vmem>>, vector<1x1x32xf32>
    %36 = vector.shape_cast %35 : vector<1x1x32xf32> to vector<1x32xf32>
    %cst_22 = arith.constant dense<0.000000e+00> : vector<24x96xf32>
    %37 = tpu.matmul %25, %30, %cst_22 {dimension_numbers = #tpu.dot_dimension_numbers<[1], [0], [0], [1], [0, 0, 1, 1], [], []>} : vector<24x32xf32>, vector<32x96xf32>, vector<24x96xf32> -> vector<24x96xf32>
    %38 = vector.broadcast %32 : vector<1x96xf32> to vector<24x96xf32>
    %39 = arith.addf %37, %38 : vector<24x96xf32>
    %40 = vector.extract_strided_slice %39 {offsets = [0, 0], sizes = [24, 32], strides = [1, 1]} : vector<24x96xf32> to vector<24x32xf32>
    %cst_23 = arith.constant 2.500000e-01 : f32
    %41 = vector.broadcast %cst_23 : f32 to vector<24x32xf32>
    %42 = arith.mulf %40, %41 : vector<24x32xf32>
    %43 = vector.extract_strided_slice %39 {offsets = [0, 32], sizes = [24, 32], strides = [1, 1]} : vector<24x96xf32> to vector<24x32xf32>
    %44 = vector.extract_strided_slice %39 {offsets = [0, 64], sizes = [24, 32], strides = [1, 1]} : vector<24x96xf32> to vector<24x32xf32>
    %cst_24 = arith.constant 0.000000e+00 : f32
    %45 = vector.broadcast %cst_24 : f32 to vector<24x32xf32>
    %46 = vector.extract_strided_slice %42 {offsets = [0, 0], sizes = [24, 16], strides = [1, 1]} : vector<24x32xf32> to vector<24x16xf32>
    %47 = vector.extract_strided_slice %43 {offsets = [0, 0], sizes = [24, 16], strides = [1, 1]} : vector<24x32xf32> to vector<24x16xf32>
    %48 = vector.extract_strided_slice %44 {offsets = [0, 0], sizes = [24, 16], strides = [1, 1]} : vector<24x32xf32> to vector<24x16xf32>
    %49 = tpu.transpose %47, [1, 0] : vector<24x16xf32> -> vector<16x24xf32>
    %cst_25 = arith.constant dense<0.000000e+00> : vector<24x24xf32>
    %50 = tpu.matmul %46, %49, %cst_25 {dimension_numbers = #tpu.dot_dimension_numbers<[1], [0], [0], [1], [0, 0, 1, 1], [], []>} : vector<24x16xf32>, vector<16x24xf32>, vector<24x24xf32> -> vector<24x24xf32>
    %cst_26 = arith.constant -1.000000e+30 : f32
    %51 = vector.broadcast %cst_26 : f32 to vector<24x24xf32>
    %52 = arith.select %28, %50, %51 : vector<24x24xi1>, vector<24x24xf32>
    %cst_27 = arith.constant dense<0xFF800000> : vector<24xf32>
    %53 = vector.multi_reduction <maximumf>, %52, %cst_27 [1] : vector<24x24xf32> to vector<24xf32>
    %54 = vector.shape_cast %53 : vector<24xf32> to vector<24x1xf32>
    %55 = vector.broadcast %54 : vector<24x1xf32> to vector<24x24xf32>
    %56 = arith.subf %52, %55 : vector<24x24xf32>
    %57 = math.exp %56 : vector<24x24xf32>
    %cst_28 = arith.constant dense<0.000000e+00> : vector<24xf32>
    %58 = vector.multi_reduction <add>, %57, %cst_28 [1] : vector<24x24xf32> to vector<24xf32>
    %59 = vector.shape_cast %58 : vector<24xf32> to vector<24x1xf32>
    %60 = tpu.reciprocal %59 {approx = true} : vector<24x1xf32> -> vector<24x1xf32>
    %61 = vector.broadcast %60 : vector<24x1xf32> to vector<24x24xf32>
    %62 = arith.mulf %57, %61 : vector<24x24xf32>
    %cst_29 = arith.constant dense<0.000000e+00> : vector<24x16xf32>
    %63 = tpu.matmul %62, %48, %cst_29 {dimension_numbers = #tpu.dot_dimension_numbers<[1], [0], [0], [1], [0, 0, 1, 1], [], []>} : vector<24x24xf32>, vector<24x16xf32>, vector<24x16xf32> -> vector<24x16xf32>
    %64 = vector.extract_strided_slice %34 {offsets = [0, 0], sizes = [16, 32], strides = [1, 1]} : vector<32x32xf32> to vector<16x32xf32>
    %cst_30 = arith.constant dense<0.000000e+00> : vector<24x32xf32>
    %65 = tpu.matmul %63, %64, %cst_30 {dimension_numbers = #tpu.dot_dimension_numbers<[1], [0], [0], [1], [0, 0, 1, 1], [], []>} : vector<24x16xf32>, vector<16x32xf32>, vector<24x32xf32> -> vector<24x32xf32>
    %66 = arith.addf %45, %65 : vector<24x32xf32>
    %67 = vector.extract_strided_slice %42 {offsets = [0, 16], sizes = [24, 16], strides = [1, 1]} : vector<24x32xf32> to vector<24x16xf32>
    %68 = vector.extract_strided_slice %43 {offsets = [0, 16], sizes = [24, 16], strides = [1, 1]} : vector<24x32xf32> to vector<24x16xf32>
    %69 = vector.extract_strided_slice %44 {offsets = [0, 16], sizes = [24, 16], strides = [1, 1]} : vector<24x32xf32> to vector<24x16xf32>
    %70 = tpu.transpose %68, [1, 0] : vector<24x16xf32> -> vector<16x24xf32>
    %cst_31 = arith.constant dense<0.000000e+00> : vector<24x24xf32>
    %71 = tpu.matmul %67, %70, %cst_31 {dimension_numbers = #tpu.dot_dimension_numbers<[1], [0], [0], [1], [0, 0, 1, 1], [], []>} : vector<24x16xf32>, vector<16x24xf32>, vector<24x24xf32> -> vector<24x24xf32>
    %cst_32 = arith.constant -1.000000e+30 : f32
    %72 = vector.broadcast %cst_32 : f32 to vector<24x24xf32>
    %73 = arith.select %28, %71, %72 : vector<24x24xi1>, vector<24x24xf32>
    %cst_33 = arith.constant dense<0xFF800000> : vector<24xf32>
    %74 = vector.multi_reduction <maximumf>, %73, %cst_33 [1] : vector<24x24xf32> to vector<24xf32>
    %75 = vector.shape_cast %74 : vector<24xf32> to vector<24x1xf32>
    %76 = vector.broadcast %75 : vector<24x1xf32> to vector<24x24xf32>
    %77 = arith.subf %73, %76 : vector<24x24xf32>
    %78 = math.exp %77 : vector<24x24xf32>
    %cst_34 = arith.constant dense<0.000000e+00> : vector<24xf32>
    %79 = vector.multi_reduction <add>, %78, %cst_34 [1] : vector<24x24xf32> to vector<24xf32>
    %80 = vector.shape_cast %79 : vector<24xf32> to vector<24x1xf32>
    %81 = tpu.reciprocal %80 {approx = true} : vector<24x1xf32> -> vector<24x1xf32>
    %82 = vector.broadcast %81 : vector<24x1xf32> to vector<24x24xf32>
    %83 = arith.mulf %78, %82 : vector<24x24xf32>
    %cst_35 = arith.constant dense<0.000000e+00> : vector<24x16xf32>
    %84 = tpu.matmul %83, %69, %cst_35 {dimension_numbers = #tpu.dot_dimension_numbers<[1], [0], [0], [1], [0, 0, 1, 1], [], []>} : vector<24x24xf32>, vector<24x16xf32>, vector<24x16xf32> -> vector<24x16xf32>
    %85 = vector.extract_strided_slice %34 {offsets = [16, 0], sizes = [16, 32], strides = [1, 1]} : vector<32x32xf32> to vector<16x32xf32>
    %cst_36 = arith.constant dense<0.000000e+00> : vector<24x32xf32>
    %86 = tpu.matmul %84, %85, %cst_36 {dimension_numbers = #tpu.dot_dimension_numbers<[1], [0], [0], [1], [0, 0, 1, 1], [], []>} : vector<24x16xf32>, vector<16x32xf32>, vector<24x32xf32> -> vector<24x32xf32>
    %87 = arith.addf %66, %86 : vector<24x32xf32>
    %88 = vector.broadcast %36 : vector<1x32xf32> to vector<24x32xf32>
    %89 = arith.addf %87, %88 : vector<24x32xf32>
    %90 = arith.addf %25, %89 : vector<24x32xf32>
    %c0_37 = arith.constant 0 : index
    %c0_38 = arith.constant 0 : index
    %c0_39 = arith.constant 0 : index
    %91 = vector.load %arg8[%c0_37, %c0_38, %c0_39] : memref<2x1x32xf32, #tpu.memory_space<vmem>>, vector<1x1x32xf32>
    %92 = vector.shape_cast %91 : vector<1x1x32xf32> to vector<1x32xf32>
    %c0_40 = arith.constant 0 : index
    %c0_41 = arith.constant 0 : index
    %c0_42 = arith.constant 0 : index
    %93 = vector.load %arg9[%c0_40, %c0_41, %c0_42] : memref<2x1x32xf32, #tpu.memory_space<vmem>>, vector<1x1x32xf32>
    %94 = vector.shape_cast %93 : vector<1x1x32xf32> to vector<1x32xf32>
    %cst_43 = arith.constant dense<0.000000e+00> : vector<24xf32>
    %95 = vector.multi_reduction <add>, %90, %cst_43 [1] : vector<24x32xf32> to vector<24xf32>
    %96 = vector.shape_cast %95 : vector<24xf32> to vector<24x1xf32>
    %cst_44 = arith.constant 3.200000e+01 : f32
    %97 = vector.broadcast %cst_44 : f32 to vector<24x1xf32>
    %98 = arith.divf %96, %97 : vector<24x1xf32>
    %99 = vector.broadcast %98 : vector<24x1xf32> to vector<24x32xf32>
    %100 = arith.subf %90, %99 : vector<24x32xf32>
    %101 = arith.mulf %100, %100 : vector<24x32xf32>
    %cst_45 = arith.constant dense<0.000000e+00> : vector<24xf32>
    %102 = vector.multi_reduction <add>, %101, %cst_45 [1] : vector<24x32xf32> to vector<24xf32>
    %103 = vector.shape_cast %102 : vector<24xf32> to vector<24x1xf32>
    %cst_46 = arith.constant 3.200000e+01 : f32
    %104 = vector.broadcast %cst_46 : f32 to vector<24x1xf32>
    %105 = arith.divf %103, %104 : vector<24x1xf32>
    %106 = vector.broadcast %98 : vector<24x1xf32> to vector<24x32xf32>
    %107 = arith.subf %90, %106 : vector<24x32xf32>
    %cst_47 = arith.constant 9.99999974E-6 : f32
    %108 = vector.broadcast %cst_47 : f32 to vector<24x1xf32>
    %109 = arith.addf %105, %108 : vector<24x1xf32>
    %110 = math.rsqrt %109 : vector<24x1xf32>
    %111 = vector.broadcast %110 : vector<24x1xf32> to vector<24x32xf32>
    %112 = arith.mulf %107, %111 : vector<24x32xf32>
    %113 = vector.broadcast %92 : vector<1x32xf32> to vector<24x32xf32>
    %114 = arith.mulf %112, %113 : vector<24x32xf32>
    %115 = vector.broadcast %94 : vector<1x32xf32> to vector<24x32xf32>
    %116 = arith.addf %114, %115 : vector<24x32xf32>
    %c0_48 = arith.constant 0 : index
    %c0_49 = arith.constant 0 : index
    %c0_50 = arith.constant 0 : index
    %117 = vector.load %arg10[%c0_48, %c0_49, %c0_50] : memref<2x32x128xf32, #tpu.memory_space<vmem>>, vector<1x32x128xf32>
    %118 = vector.shape_cast %117 : vector<1x32x128xf32> to vector<32x128xf32>
    %cst_51 = arith.constant dense<0.000000e+00> : vector<24x128xf32>
    %119 = tpu.matmul %116, %118, %cst_51 {dimension_numbers = #tpu.dot_dimension_numbers<[1], [0], [0], [1], [0, 0, 1, 1], [], []>} : vector<24x32xf32>, vector<32x128xf32>, vector<24x128xf32> -> vector<24x128xf32>
    %c0_52 = arith.constant 0 : index
    %c0_53 = arith.constant 0 : index
    %c0_54 = arith.constant 0 : index
    %120 = vector.load %arg11[%c0_52, %c0_53, %c0_54] : memref<2x1x128xf32, #tpu.memory_space<vmem>>, vector<1x1x128xf32>
    %121 = vector.shape_cast %120 : vector<1x1x128xf32> to vector<1x128xf32>
    %122 = vector.broadcast %121 : vector<1x128xf32> to vector<24x128xf32>
    %123 = arith.addf %119, %122 : vector<24x128xf32>
    %cst_55 = arith.constant 5.000000e-01 : f32
    %124 = vector.broadcast %cst_55 : f32 to vector<24x128xf32>
    %125 = arith.mulf %124, %123 : vector<24x128xf32>
    %cst_56 = arith.constant 4.471500e-02 : f32
    %126 = vector.broadcast %cst_56 : f32 to vector<24x128xf32>
    %127 = arith.mulf %126, %123 : vector<24x128xf32>
    %128 = arith.mulf %127, %123 : vector<24x128xf32>
    %129 = arith.mulf %128, %123 : vector<24x128xf32>
    %130 = arith.addf %123, %129 : vector<24x128xf32>
    %cst_57 = arith.constant 0.797884583 : f32
    %131 = vector.broadcast %cst_57 : f32 to vector<24x128xf32>
    %132 = arith.mulf %131, %130 : vector<24x128xf32>
    %133 = math.tanh %132 : vector<24x128xf32>
    %cst_58 = arith.constant 1.000000e+00 : f32
    %134 = vector.broadcast %cst_58 : f32 to vector<24x128xf32>
    %135 = arith.addf %134, %133 : vector<24x128xf32>
    %136 = arith.mulf %125, %135 : vector<24x128xf32>
    %c0_59 = arith.constant 0 : index
    %c0_60 = arith.constant 0 : index
    %c0_61 = arith.constant 0 : index
    %137 = vector.load %arg12[%c0_59, %c0_60, %c0_61] : memref<2x128x32xf32, #tpu.memory_space<vmem>>, vector<1x128x32xf32>
    %138 = vector.shape_cast %137 : vector<1x128x32xf32> to vector<128x32xf32>
    %cst_62 = arith.constant dense<0.000000e+00> : vector<24x32xf32>
    %139 = tpu.matmul %136, %138, %cst_62 {dimension_numbers = #tpu.dot_dimension_numbers<[1], [0], [0], [1], [0, 0, 1, 1], [], []>} : vector<24x128xf32>, vector<128x32xf32>, vector<24x32xf32> -> vector<24x32xf32>
    %c0_63 = arith.constant 0 : index
    %c0_64 = arith.constant 0 : index
    %c0_65 = arith.constant 0 : index
    %140 = vector.load %arg13[%c0_63, %c0_64, %c0_65] : memref<2x1x32xf32, #tpu.memory_space<vmem>>, vector<1x1x32xf32>
    %141 = vector.shape_cast %140 : vector<1x1x32xf32> to vector<1x32xf32>
    %142 = vector.broadcast %141 : vector<1x32xf32> to vector<24x32xf32>
    %143 = arith.addf %139, %142 : vector<24x32xf32>
    %144 = arith.addf %116, %143 : vector<24x32xf32>
    %c0_66 = arith.constant 0 : index
    %c0_67 = arith.constant 0 : index
    %c0_68 = arith.constant 0 : index
    %145 = vector.load %arg14[%c0_66, %c0_67, %c0_68] : memref<2x1x32xf32, #tpu.memory_space<vmem>>, vector<1x1x32xf32>
    %146 = vector.shape_cast %145 : vector<1x1x32xf32> to vector<1x32xf32>
    %c0_69 = arith.constant 0 : index
    %c0_70 = arith.constant 0 : index
    %c0_71 = arith.constant 0 : index
    %147 = vector.load %arg15[%c0_69, %c0_70, %c0_71] : memref<2x1x32xf32, #tpu.memory_space<vmem>>, vector<1x1x32xf32>
    %148 = vector.shape_cast %147 : vector<1x1x32xf32> to vector<1x32xf32>
    %cst_72 = arith.constant dense<0.000000e+00> : vector<24xf32>
    %149 = vector.multi_reduction <add>, %144, %cst_72 [1] : vector<24x32xf32> to vector<24xf32>
    %150 = vector.shape_cast %149 : vector<24xf32> to vector<24x1xf32>
    %cst_73 = arith.constant 3.200000e+01 : f32
    %151 = vector.broadcast %cst_73 : f32 to vector<24x1xf32>
    %152 = arith.divf %150, %151 : vector<24x1xf32>
    %153 = vector.broadcast %152 : vector<24x1xf32> to vector<24x32xf32>
    %154 = arith.subf %144, %153 : vector<24x32xf32>
    %155 = arith.mulf %154, %154 : vector<24x32xf32>
    %cst_74 = arith.constant dense<0.000000e+00> : vector<24xf32>
    %156 = vector.multi_reduction <add>, %155, %cst_74 [1] : vector<24x32xf32> to vector<24xf32>
    %157 = vector.shape_cast %156 : vector<24xf32> to vector<24x1xf32>
    %cst_75 = arith.constant 3.200000e+01 : f32
    %158 = vector.broadcast %cst_75 : f32 to vector<24x1xf32>
    %159 = arith.divf %157, %158 : vector<24x1xf32>
    %160 = vector.broadcast %152 : vector<24x1xf32> to vector<24x32xf32>
    %161 = arith.subf %144, %160 : vector<24x32xf32>
    %cst_76 = arith.constant 9.99999974E-6 : f32
    %162 = vector.broadcast %cst_76 : f32 to vector<24x1xf32>
    %163 = arith.addf %159, %162 : vector<24x1xf32>
    %164 = math.rsqrt %163 : vector<24x1xf32>
    %165 = vector.broadcast %164 : vector<24x1xf32> to vector<24x32xf32>
    %166 = arith.mulf %161, %165 : vector<24x32xf32>
    %167 = vector.broadcast %146 : vector<1x32xf32> to vector<24x32xf32>
    %168 = arith.mulf %166, %167 : vector<24x32xf32>
    %169 = vector.broadcast %148 : vector<1x32xf32> to vector<24x32xf32>
    %170 = arith.addf %168, %169 : vector<24x32xf32>
    %c1 = arith.constant 1 : index
    %c0_77 = arith.constant 0 : index
    %c0_78 = arith.constant 0 : index
    %171 = vector.load %arg4[%c1, %c0_77, %c0_78] : memref<2x32x96xf32, #tpu.memory_space<vmem>>, vector<1x32x96xf32>
    %172 = vector.shape_cast %171 : vector<1x32x96xf32> to vector<32x96xf32>
    %c1_79 = arith.constant 1 : index
    %c0_80 = arith.constant 0 : index
    %c0_81 = arith.constant 0 : index
    %173 = vector.load %arg5[%c1_79, %c0_80, %c0_81] : memref<2x1x96xf32, #tpu.memory_space<vmem>>, vector<1x1x96xf32>
    %174 = vector.shape_cast %173 : vector<1x1x96xf32> to vector<1x96xf32>
    %c1_82 = arith.constant 1 : index
    %c0_83 = arith.constant 0 : index
    %c0_84 = arith.constant 0 : index
    %175 = vector.load %arg6[%c1_82, %c0_83, %c0_84] : memref<2x32x32xf32, #tpu.memory_space<vmem>>, vector<1x32x32xf32>
    %176 = vector.shape_cast %175 : vector<1x32x32xf32> to vector<32x32xf32>
    %c1_85 = arith.constant 1 : index
    %c0_86 = arith.constant 0 : index
    %c0_87 = arith.constant 0 : index
    %177 = vector.load %arg7[%c1_85, %c0_86, %c0_87] : memref<2x1x32xf32, #tpu.memory_space<vmem>>, vector<1x1x32xf32>
    %178 = vector.shape_cast %177 : vector<1x1x32xf32> to vector<1x32xf32>
    %cst_88 = arith.constant dense<0.000000e+00> : vector<24x96xf32>
    %179 = tpu.matmul %170, %172, %cst_88 {dimension_numbers = #tpu.dot_dimension_numbers<[1], [0], [0], [1], [0, 0, 1, 1], [], []>} : vector<24x32xf32>, vector<32x96xf32>, vector<24x96xf32> -> vector<24x96xf32>
    %180 = vector.broadcast %174 : vector<1x96xf32> to vector<24x96xf32>
    %181 = arith.addf %179, %180 : vector<24x96xf32>
    %182 = vector.extract_strided_slice %181 {offsets = [0, 0], sizes = [24, 32], strides = [1, 1]} : vector<24x96xf32> to vector<24x32xf32>
    %cst_89 = arith.constant 2.500000e-01 : f32
    %183 = vector.broadcast %cst_89 : f32 to vector<24x32xf32>
    %184 = arith.mulf %182, %183 : vector<24x32xf32>
    %185 = vector.extract_strided_slice %181 {offsets = [0, 32], sizes = [24, 32], strides = [1, 1]} : vector<24x96xf32> to vector<24x32xf32>
    %186 = vector.extract_strided_slice %181 {offsets = [0, 64], sizes = [24, 32], strides = [1, 1]} : vector<24x96xf32> to vector<24x32xf32>
    %cst_90 = arith.constant 0.000000e+00 : f32
    %187 = vector.broadcast %cst_90 : f32 to vector<24x32xf32>
    %188 = vector.extract_strided_slice %184 {offsets = [0, 0], sizes = [24, 16], strides = [1, 1]} : vector<24x32xf32> to vector<24x16xf32>
    %189 = vector.extract_strided_slice %185 {offsets = [0, 0], sizes = [24, 16], strides = [1, 1]} : vector<24x32xf32> to vector<24x16xf32>
    %190 = vector.extract_strided_slice %186 {offsets = [0, 0], sizes = [24, 16], strides = [1, 1]} : vector<24x32xf32> to vector<24x16xf32>
    %191 = tpu.transpose %189, [1, 0] : vector<24x16xf32> -> vector<16x24xf32>
    %cst_91 = arith.constant dense<0.000000e+00> : vector<24x24xf32>
    %192 = tpu.matmul %188, %191, %cst_91 {dimension_numbers = #tpu.dot_dimension_numbers<[1], [0], [0], [1], [0, 0, 1, 1], [], []>} : vector<24x16xf32>, vector<16x24xf32>, vector<24x24xf32> -> vector<24x24xf32>
    %cst_92 = arith.constant -1.000000e+30 : f32
    %193 = vector.broadcast %cst_92 : f32 to vector<24x24xf32>
    %194 = arith.select %28, %192, %193 : vector<24x24xi1>, vector<24x24xf32>
    %cst_93 = arith.constant dense<0xFF800000> : vector<24xf32>
    %195 = vector.multi_reduction <maximumf>, %194, %cst_93 [1] : vector<24x24xf32> to vector<24xf32>
    %196 = vector.shape_cast %195 : vector<24xf32> to vector<24x1xf32>
    %197 = vector.broadcast %196 : vector<24x1xf32> to vector<24x24xf32>
    %198 = arith.subf %194, %197 : vector<24x24xf32>
    %199 = math.exp %198 : vector<24x24xf32>
    %cst_94 = arith.constant dense<0.000000e+00> : vector<24xf32>
    %200 = vector.multi_reduction <add>, %199, %cst_94 [1] : vector<24x24xf32> to vector<24xf32>
    %201 = vector.shape_cast %200 : vector<24xf32> to vector<24x1xf32>
    %202 = tpu.reciprocal %201 {approx = true} : vector<24x1xf32> -> vector<24x1xf32>
    %203 = vector.broadcast %202 : vector<24x1xf32> to vector<24x24xf32>
    %204 = arith.mulf %199, %203 : vector<24x24xf32>
    %cst_95 = arith.constant dense<0.000000e+00> : vector<24x16xf32>
    %205 = tpu.matmul %204, %190, %cst_95 {dimension_numbers = #tpu.dot_dimension_numbers<[1], [0], [0], [1], [0, 0, 1, 1], [], []>} : vector<24x24xf32>, vector<24x16xf32>, vector<24x16xf32> -> vector<24x16xf32>
    %206 = vector.extract_strided_slice %176 {offsets = [0, 0], sizes = [16, 32], strides = [1, 1]} : vector<32x32xf32> to vector<16x32xf32>
    %cst_96 = arith.constant dense<0.000000e+00> : vector<24x32xf32>
    %207 = tpu.matmul %205, %206, %cst_96 {dimension_numbers = #tpu.dot_dimension_numbers<[1], [0], [0], [1], [0, 0, 1, 1], [], []>} : vector<24x16xf32>, vector<16x32xf32>, vector<24x32xf32> -> vector<24x32xf32>
    %208 = arith.addf %187, %207 : vector<24x32xf32>
    %209 = vector.extract_strided_slice %184 {offsets = [0, 16], sizes = [24, 16], strides = [1, 1]} : vector<24x32xf32> to vector<24x16xf32>
    %210 = vector.extract_strided_slice %185 {offsets = [0, 16], sizes = [24, 16], strides = [1, 1]} : vector<24x32xf32> to vector<24x16xf32>
    %211 = vector.extract_strided_slice %186 {offsets = [0, 16], sizes = [24, 16], strides = [1, 1]} : vector<24x32xf32> to vector<24x16xf32>
    %212 = tpu.transpose %210, [1, 0] : vector<24x16xf32> -> vector<16x24xf32>
    %cst_97 = arith.constant dense<0.000000e+00> : vector<24x24xf32>
    %213 = tpu.matmul %209, %212, %cst_97 {dimension_numbers = #tpu.dot_dimension_numbers<[1], [0], [0], [1], [0, 0, 1, 1], [], []>} : vector<24x16xf32>, vector<16x24xf32>, vector<24x24xf32> -> vector<24x24xf32>
    %cst_98 = arith.constant -1.000000e+30 : f32
    %214 = vector.broadcast %cst_98 : f32 to vector<24x24xf32>
    %215 = arith.select %28, %213, %214 : vector<24x24xi1>, vector<24x24xf32>
    %cst_99 = arith.constant dense<0xFF800000> : vector<24xf32>
    %216 = vector.multi_reduction <maximumf>, %215, %cst_99 [1] : vector<24x24xf32> to vector<24xf32>
    %217 = vector.shape_cast %216 : vector<24xf32> to vector<24x1xf32>
    %218 = vector.broadcast %217 : vector<24x1xf32> to vector<24x24xf32>
    %219 = arith.subf %215, %218 : vector<24x24xf32>
    %220 = math.exp %219 : vector<24x24xf32>
    %cst_100 = arith.constant dense<0.000000e+00> : vector<24xf32>
    %221 = vector.multi_reduction <add>, %220, %cst_100 [1] : vector<24x24xf32> to vector<24xf32>
    %222 = vector.shape_cast %221 : vector<24xf32> to vector<24x1xf32>
    %223 = tpu.reciprocal %222 {approx = true} : vector<24x1xf32> -> vector<24x1xf32>
    %224 = vector.broadcast %223 : vector<24x1xf32> to vector<24x24xf32>
    %225 = arith.mulf %220, %224 : vector<24x24xf32>
    %cst_101 = arith.constant dense<0.000000e+00> : vector<24x16xf32>
    %226 = tpu.matmul %225, %211, %cst_101 {dimension_numbers = #tpu.dot_dimension_numbers<[1], [0], [0], [1], [0, 0, 1, 1], [], []>} : vector<24x24xf32>, vector<24x16xf32>, vector<24x16xf32> -> vector<24x16xf32>
    %227 = vector.extract_strided_slice %176 {offsets = [16, 0], sizes = [16, 32], strides = [1, 1]} : vector<32x32xf32> to vector<16x32xf32>
    %cst_102 = arith.constant dense<0.000000e+00> : vector<24x32xf32>
    %228 = tpu.matmul %226, %227, %cst_102 {dimension_numbers = #tpu.dot_dimension_numbers<[1], [0], [0], [1], [0, 0, 1, 1], [], []>} : vector<24x16xf32>, vector<16x32xf32>, vector<24x32xf32> -> vector<24x32xf32>
    %229 = arith.addf %208, %228 : vector<24x32xf32>
    %230 = vector.broadcast %178 : vector<1x32xf32> to vector<24x32xf32>
    %231 = arith.addf %229, %230 : vector<24x32xf32>
    %232 = arith.addf %170, %231 : vector<24x32xf32>
    %c1_103 = arith.constant 1 : index
    %c0_104 = arith.constant 0 : index
    %c0_105 = arith.constant 0 : index
    %233 = vector.load %arg8[%c1_103, %c0_104, %c0_105] : memref<2x1x32xf32, #tpu.memory_space<vmem>>, vector<1x1x32xf32>
    %234 = vector.shape_cast %233 : vector<1x1x32xf32> to vector<1x32xf32>
    %c1_106 = arith.constant 1 : index
    %c0_107 = arith.constant 0 : index
    %c0_108 = arith.constant 0 : index
    %235 = vector.load %arg9[%c1_106, %c0_107, %c0_108] : memref<2x1x32xf32, #tpu.memory_space<vmem>>, vector<1x1x32xf32>
    %236 = vector.shape_cast %235 : vector<1x1x32xf32> to vector<1x32xf32>
    %cst_109 = arith.constant dense<0.000000e+00> : vector<24xf32>
    %237 = vector.multi_reduction <add>, %232, %cst_109 [1] : vector<24x32xf32> to vector<24xf32>
    %238 = vector.shape_cast %237 : vector<24xf32> to vector<24x1xf32>
    %cst_110 = arith.constant 3.200000e+01 : f32
    %239 = vector.broadcast %cst_110 : f32 to vector<24x1xf32>
    %240 = arith.divf %238, %239 : vector<24x1xf32>
    %241 = vector.broadcast %240 : vector<24x1xf32> to vector<24x32xf32>
    %242 = arith.subf %232, %241 : vector<24x32xf32>
    %243 = arith.mulf %242, %242 : vector<24x32xf32>
    %cst_111 = arith.constant dense<0.000000e+00> : vector<24xf32>
    %244 = vector.multi_reduction <add>, %243, %cst_111 [1] : vector<24x32xf32> to vector<24xf32>
    %245 = vector.shape_cast %244 : vector<24xf32> to vector<24x1xf32>
    %cst_112 = arith.constant 3.200000e+01 : f32
    %246 = vector.broadcast %cst_112 : f32 to vector<24x1xf32>
    %247 = arith.divf %245, %246 : vector<24x1xf32>
    %248 = vector.broadcast %240 : vector<24x1xf32> to vector<24x32xf32>
    %249 = arith.subf %232, %248 : vector<24x32xf32>
    %cst_113 = arith.constant 9.99999974E-6 : f32
    %250 = vector.broadcast %cst_113 : f32 to vector<24x1xf32>
    %251 = arith.addf %247, %250 : vector<24x1xf32>
    %252 = math.rsqrt %251 : vector<24x1xf32>
    %253 = vector.broadcast %252 : vector<24x1xf32> to vector<24x32xf32>
    %254 = arith.mulf %249, %253 : vector<24x32xf32>
    %255 = vector.broadcast %234 : vector<1x32xf32> to vector<24x32xf32>
    %256 = arith.mulf %254, %255 : vector<24x32xf32>
    %257 = vector.broadcast %236 : vector<1x32xf32> to vector<24x32xf32>
    %258 = arith.addf %256, %257 : vector<24x32xf32>
    %c1_114 = arith.constant 1 : index
    %c0_115 = arith.constant 0 : index
    %c0_116 = arith.constant 0 : index
    %259 = vector.load %arg10[%c1_114, %c0_115, %c0_116] : memref<2x32x128xf32, #tpu.memory_space<vmem>>, vector<1x32x128xf32>
    %260 = vector.shape_cast %259 : vector<1x32x128xf32> to vector<32x128xf32>
    %cst_117 = arith.constant dense<0.000000e+00> : vector<24x128xf32>
    %261 = tpu.matmul %258, %260, %cst_117 {dimension_numbers = #tpu.dot_dimension_numbers<[1], [0], [0], [1], [0, 0, 1, 1], [], []>} : vector<24x32xf32>, vector<32x128xf32>, vector<24x128xf32> -> vector<24x128xf32>
    %c1_118 = arith.constant 1 : index
    %c0_119 = arith.constant 0 : index
    %c0_120 = arith.constant 0 : index
    %262 = vector.load %arg11[%c1_118, %c0_119, %c0_120] : memref<2x1x128xf32, #tpu.memory_space<vmem>>, vector<1x1x128xf32>
    %263 = vector.shape_cast %262 : vector<1x1x128xf32> to vector<1x128xf32>
    %264 = vector.broadcast %263 : vector<1x128xf32> to vector<24x128xf32>
    %265 = arith.addf %261, %264 : vector<24x128xf32>
    %cst_121 = arith.constant 5.000000e-01 : f32
    %266 = vector.broadcast %cst_121 : f32 to vector<24x128xf32>
    %267 = arith.mulf %266, %265 : vector<24x128xf32>
    %cst_122 = arith.constant 4.471500e-02 : f32
    %268 = vector.broadcast %cst_122 : f32 to vector<24x128xf32>
    %269 = arith.mulf %268, %265 : vector<24x128xf32>
    %270 = arith.mulf %269, %265 : vector<24x128xf32>
    %271 = arith.mulf %270, %265 : vector<24x128xf32>
    %272 = arith.addf %265, %271 : vector<24x128xf32>
    %cst_123 = arith.constant 0.797884583 : f32
    %273 = vector.broadcast %cst_123 : f32 to vector<24x128xf32>
    %274 = arith.mulf %273, %272 : vector<24x128xf32>
    %275 = math.tanh %274 : vector<24x128xf32>
    %cst_124 = arith.constant 1.000000e+00 : f32
    %276 = vector.broadcast %cst_124 : f32 to vector<24x128xf32>
    %277 = arith.addf %276, %275 : vector<24x128xf32>
    %278 = arith.mulf %267, %277 : vector<24x128xf32>
    %c1_125 = arith.constant 1 : index
    %c0_126 = arith.constant 0 : index
    %c0_127 = arith.constant 0 : index
    %279 = vector.load %arg12[%c1_125, %c0_126, %c0_127] : memref<2x128x32xf32, #tpu.memory_space<vmem>>, vector<1x128x32xf32>
    %280 = vector.shape_cast %279 : vector<1x128x32xf32> to vector<128x32xf32>
    %cst_128 = arith.constant dense<0.000000e+00> : vector<24x32xf32>
    %281 = tpu.matmul %278, %280, %cst_128 {dimension_numbers = #tpu.dot_dimension_numbers<[1], [0], [0], [1], [0, 0, 1, 1], [], []>} : vector<24x128xf32>, vector<128x32xf32>, vector<24x32xf32> -> vector<24x32xf32>
    %c1_129 = arith.constant 1 : index
    %c0_130 = arith.constant 0 : index
    %c0_131 = arith.constant 0 : index
    %282 = vector.load %arg13[%c1_129, %c0_130, %c0_131] : memref<2x1x32xf32, #tpu.memory_space<vmem>>, vector<1x1x32xf32>
    %283 = vector.shape_cast %282 : vector<1x1x32xf32> to vector<1x32xf32>
    %284 = vector.broadcast %283 : vector<1x32xf32> to vector<24x32xf32>
    %285 = arith.addf %281, %284 : vector<24x32xf32>
    %286 = arith.addf %258, %285 : vector<24x32xf32>
    %c1_132 = arith.constant 1 : index
    %c0_133 = arith.constant 0 : index
    %c0_134 = arith.constant 0 : index
    %287 = vector.load %arg14[%c1_132, %c0_133, %c0_134] : memref<2x1x32xf32, #tpu.memory_space<vmem>>, vector<1x1x32xf32>
    %288 = vector.shape_cast %287 : vector<1x1x32xf32> to vector<1x32xf32>
    %c1_135 = arith.constant 1 : index
    %c0_136 = arith.constant 0 : index
    %c0_137 = arith.constant 0 : index
    %289 = vector.load %arg15[%c1_135, %c0_136, %c0_137] : memref<2x1x32xf32, #tpu.memory_space<vmem>>, vector<1x1x32xf32>
    %290 = vector.shape_cast %289 : vector<1x1x32xf32> to vector<1x32xf32>
    %cst_138 = arith.constant dense<0.000000e+00> : vector<24xf32>
    %291 = vector.multi_reduction <add>, %286, %cst_138 [1] : vector<24x32xf32> to vector<24xf32>
    %292 = vector.shape_cast %291 : vector<24xf32> to vector<24x1xf32>
    %cst_139 = arith.constant 3.200000e+01 : f32
    %293 = vector.broadcast %cst_139 : f32 to vector<24x1xf32>
    %294 = arith.divf %292, %293 : vector<24x1xf32>
    %295 = vector.broadcast %294 : vector<24x1xf32> to vector<24x32xf32>
    %296 = arith.subf %286, %295 : vector<24x32xf32>
    %297 = arith.mulf %296, %296 : vector<24x32xf32>
    %cst_140 = arith.constant dense<0.000000e+00> : vector<24xf32>
    %298 = vector.multi_reduction <add>, %297, %cst_140 [1] : vector<24x32xf32> to vector<24xf32>
    %299 = vector.shape_cast %298 : vector<24xf32> to vector<24x1xf32>
    %cst_141 = arith.constant 3.200000e+01 : f32
    %300 = vector.broadcast %cst_141 : f32 to vector<24x1xf32>
    %301 = arith.divf %299, %300 : vector<24x1xf32>
    %302 = vector.broadcast %294 : vector<24x1xf32> to vector<24x32xf32>
    %303 = arith.subf %286, %302 : vector<24x32xf32>
    %cst_142 = arith.constant 9.99999974E-6 : f32
    %304 = vector.broadcast %cst_142 : f32 to vector<24x1xf32>
    %305 = arith.addf %301, %304 : vector<24x1xf32>
    %306 = math.rsqrt %305 : vector<24x1xf32>
    %307 = vector.broadcast %306 : vector<24x1xf32> to vector<24x32xf32>
    %308 = arith.mulf %303, %307 : vector<24x32xf32>
    %309 = vector.broadcast %288 : vector<1x32xf32> to vector<24x32xf32>
    %310 = arith.mulf %308, %309 : vector<24x32xf32>
    %311 = vector.broadcast %290 : vector<1x32xf32> to vector<24x32xf32>
    %312 = arith.addf %310, %311 : vector<24x32xf32>
    %c0_143 = arith.constant 0 : index
    %c0_144 = arith.constant 0 : index
    %313 = vector.load %arg16[%c0_143, %c0_144] : memref<32x7xf32, #tpu.memory_space<vmem>>, vector<32x7xf32>
    %cst_145 = arith.constant dense<0.000000e+00> : vector<24x7xf32>
    %314 = tpu.matmul %312, %313, %cst_145 {dimension_numbers = #tpu.dot_dimension_numbers<[1], [0], [0], [1], [0, 0, 1, 1], [], []>} : vector<24x32xf32>, vector<32x7xf32>, vector<24x7xf32> -> vector<24x7xf32>
    %c0_146 = arith.constant 0 : index
    %c0_147 = arith.constant 0 : index
    %315 = vector.load %arg17[%c0_146, %c0_147] : memref<1x7xf32, #tpu.memory_space<vmem>>, vector<1x7xf32>
    %316 = vector.broadcast %315 : vector<1x7xf32> to vector<24x7xf32>
    %317 = arith.addf %314, %316 : vector<24x7xf32>
    %318 = tpu.iota {dimensions = array<i32: 1>} : vector<24x7xi32>
    %c5_i32 = arith.constant 5 : i32
    %319 = vector.broadcast %c5_i32 : i32 to vector<24x7xi32>
    %320 = arith.cmpi sge, %318, %319 : vector<24x7xi32>
    %321 = math.tanh %317 : vector<24x7xf32>
    %322 = arith.select %320, %321, %317 : vector<24x7xi1>, vector<24x7xf32>
    %c0_148 = arith.constant 0 : index
    %c0_149 = arith.constant 0 : index
    %c0_150 = arith.constant 0 : index
    %323 = vector.load %arg18[%c0_148, %c0_149, %c0_150] : memref<1x24x7xf32, #tpu.memory_space<vmem>>, vector<1x24x7xf32>
    %324 = vector.shape_cast %323 : vector<1x24x7xf32> to vector<24x7xf32>
    %325 = vector.shape_cast %322 : vector<24x7xf32> to vector<1x24x7xf32>
    tpu.vector_store %arg18[%c0_148, %c0_149, %c0_150], %325 {strides = array<i32>} : memref<1x24x7xf32, #tpu.memory_space<vmem>>, vector<1x24x7xf32>,
    return
  }
  func.func @transform_0(%arg0: i32) -> (i32, i32, i32) {
    %c0_i32 = arith.constant 0 : i32
    %c0_i32_0 = arith.constant 0 : i32
    %c0_i32_1 = arith.constant 0 : i32
    return %arg0, %c0_i32, %c0_i32_0 : i32, i32, i32
  }
  func.func @transform_1(%arg0: i32) -> (i32, i32) {
    %c0_i32 = arith.constant 0 : i32
    %c0_i32_0 = arith.constant 0 : i32
    %c0_i32_1 = arith.constant 0 : i32
    return %c0_i32, %c0_i32_0 : i32, i32
  }
  func.func @transform_2(%arg0: i32) -> (i32, i32) {
    %c0_i32 = arith.constant 0 : i32
    %c0_i32_0 = arith.constant 0 : i32
    %c0_i32_1 = arith.constant 0 : i32
    return %c0_i32, %c0_i32_0 : i32, i32
  }
  func.func @transform_3(%arg0: i32) -> (i32, i32, i32) {
    %c0_i32 = arith.constant 0 : i32
    %c0_i32_0 = arith.constant 0 : i32
    %c0_i32_1 = arith.constant 0 : i32
    %c0_i32_2 = arith.constant 0 : i32
    return %c0_i32, %c0_i32_0, %c0_i32_1 : i32, i32, i32
  }
  func.func @transform_4(%arg0: i32) -> (i32, i32, i32) {
    %c0_i32 = arith.constant 0 : i32
    %c0_i32_0 = arith.constant 0 : i32
    %c0_i32_1 = arith.constant 0 : i32
    %c0_i32_2 = arith.constant 0 : i32
    return %c0_i32, %c0_i32_0, %c0_i32_1 : i32, i32, i32
  }
  func.func @transform_5(%arg0: i32) -> (i32, i32, i32) {
    %c0_i32 = arith.constant 0 : i32
    %c0_i32_0 = arith.constant 0 : i32
    %c0_i32_1 = arith.constant 0 : i32
    %c0_i32_2 = arith.constant 0 : i32
    return %c0_i32, %c0_i32_0, %c0_i32_1 : i32, i32, i32
  }
  func.func @transform_6(%arg0: i32) -> (i32, i32, i32) {
    %c0_i32 = arith.constant 0 : i32
    %c0_i32_0 = arith.constant 0 : i32
    %c0_i32_1 = arith.constant 0 : i32
    %c0_i32_2 = arith.constant 0 : i32
    return %c0_i32, %c0_i32_0, %c0_i32_1 : i32, i32, i32
  }
  func.func @transform_7(%arg0: i32) -> (i32, i32, i32) {
    %c0_i32 = arith.constant 0 : i32
    %c0_i32_0 = arith.constant 0 : i32
    %c0_i32_1 = arith.constant 0 : i32
    %c0_i32_2 = arith.constant 0 : i32
    return %c0_i32, %c0_i32_0, %c0_i32_1 : i32, i32, i32
  }
  func.func @transform_8(%arg0: i32) -> (i32, i32, i32) {
    %c0_i32 = arith.constant 0 : i32
    %c0_i32_0 = arith.constant 0 : i32
    %c0_i32_1 = arith.constant 0 : i32
    %c0_i32_2 = arith.constant 0 : i32
    return %c0_i32, %c0_i32_0, %c0_i32_1 : i32, i32, i32
  }
  func.func @transform_9(%arg0: i32) -> (i32, i32, i32) {
    %c0_i32 = arith.constant 0 : i32
    %c0_i32_0 = arith.constant 0 : i32
    %c0_i32_1 = arith.constant 0 : i32
    %c0_i32_2 = arith.constant 0 : i32
    return %c0_i32, %c0_i32_0, %c0_i32_1 : i32, i32, i32
  }
  func.func @transform_10(%arg0: i32) -> (i32, i32, i32) {
    %c0_i32 = arith.constant 0 : i32
    %c0_i32_0 = arith.constant 0 : i32
    %c0_i32_1 = arith.constant 0 : i32
    %c0_i32_2 = arith.constant 0 : i32
    return %c0_i32, %c0_i32_0, %c0_i32_1 : i32, i32, i32
  }
  func.func @transform_11(%arg0: i32) -> (i32, i32, i32) {
    %c0_i32 = arith.constant 0 : i32
    %c0_i32_0 = arith.constant 0 : i32
    %c0_i32_1 = arith.constant 0 : i32
    %c0_i32_2 = arith.constant 0 : i32
    return %c0_i32, %c0_i32_0, %c0_i32_1 : i32, i32, i32
  }
  func.func @transform_12(%arg0: i32) -> (i32, i32, i32) {
    %c0_i32 = arith.constant 0 : i32
    %c0_i32_0 = arith.constant 0 : i32
    %c0_i32_1 = arith.constant 0 : i32
    %c0_i32_2 = arith.constant 0 : i32
    return %c0_i32, %c0_i32_0, %c0_i32_1 : i32, i32, i32
  }
  func.func @transform_13(%arg0: i32) -> (i32, i32, i32) {
    %c0_i32 = arith.constant 0 : i32
    %c0_i32_0 = arith.constant 0 : i32
    %c0_i32_1 = arith.constant 0 : i32
    %c0_i32_2 = arith.constant 0 : i32
    return %c0_i32, %c0_i32_0, %c0_i32_1 : i32, i32, i32
  }
  func.func @transform_14(%arg0: i32) -> (i32, i32, i32) {
    %c0_i32 = arith.constant 0 : i32
    %c0_i32_0 = arith.constant 0 : i32
    %c0_i32_1 = arith.constant 0 : i32
    %c0_i32_2 = arith.constant 0 : i32
    return %c0_i32, %c0_i32_0, %c0_i32_1 : i32, i32, i32
  }
  func.func @transform_15(%arg0: i32) -> (i32, i32) {
    %c0_i32 = arith.constant 0 : i32
    %c0_i32_0 = arith.constant 0 : i32
    %c0_i32_1 = arith.constant 0 : i32
    return %c0_i32, %c0_i32_0 : i32, i32
  }
  func.func @transform_16(%arg0: i32) -> (i32, i32) {
    %c0_i32 = arith.constant 0 : i32
    %c0_i32_0 = arith.constant 0 : i32
    %c0_i32_1 = arith.constant 0 : i32
    return %c0_i32, %c0_i32_0 : i32, i32
  }
  func.func @transform_17(%arg0: i32) -> (i32, i32, i32) {
    %c0_i32 = arith.constant 0 : i32
    %c0_i32_0 = arith.constant 0 : i32
    %c0_i32_1 = arith.constant 0 : i32
    return %arg0, %c0_i32, %c0_i32_0 : i32, i32, i32
  }
}

</mosaic_0001>

<bundles_post_ra>
// kernel: decision_transformer_forward.1
= control target key start
LH: loop header
LB: loop body
LE: loop exit
PB: predicated region body
PF: predicated region fallthrough
CT: control target
= control target key end

     0   :  { %s4040_s24 = smov 0   ;;  %s4747_s0 = inlined_call_operand.vmem [shape: f32[2,24,32], index: 0, kind: input, shape index: {}]   ;;  %s4748_s1 = inlined_call_operand.vmem [shape: f32[1,32], index: 1, kind: input, shape index: {}]   ;;  %s4749_s2 = inlined_call_operand.vmem [shape: f32[1,32], index: 2, kind: input, shape index: {}]   ;;  %s4750_s3 = inlined_call_operand.vmem [shape: f32[2,32,96], index: 3, kind: input, shape index: {}]   ;;  %s4751_s4 = inlined_call_operand.vmem [shape: f32[2,1,96], index: 4, kind: input, shape index: {}]   ;;  %s4752_s5 = inlined_call_operand.vmem [shape: f32[2,32,32], index: 5, kind: input, shape index: {}]   ;;  %s4753_s6 = inlined_call_operand.vmem [shape: f32[2,1,32], index: 6, kind: input, shape index: {}]   ;;  %s4754_s7 = inlined_call_operand.vmem [shape: f32[2,1,32], index: 7, kind: input, shape index: {}]   ;;  %s4755_s8 = inlined_call_operand.vmem [shape: f32[2,1,32], index: 8, kind: input, shape index: {}]   ;;  %s4756_s9 = inlined_call_operand.vmem [shape: f32[2,32,128], index: 9, kind: input, shape index: {}]   ;;  %s4757_s10 = inlined_call_operand.vmem [shape: f32[2,1,128], index: 10, kind: input, shape index: {}]   ;;  %s4758_s11 = inlined_call_operand.vmem [shape: f32[2,128,32], index: 11, kind: input, shape index: {}]   ;;  %s4759_s12 = inlined_call_operand.vmem [shape: f32[2,1,32], index: 12, kind: input, shape index: {}]   ;;  %s4760_s13 = inlined_call_operand.vmem [shape: f32[2,1,32], index: 13, kind: input, shape index: {}]   ;;  %s4761_s14 = inlined_call_operand.vmem [shape: f32[2,1,32], index: 14, kind: input, shape index: {}]   ;;  %s4762_s15 = inlined_call_operand.vmem [shape: f32[32,7], index: 15, kind: input, shape index: {}]   ;;  %s4763_s16 = inlined_call_operand.vmem [shape: f32[1,7], index: 16, kind: input, shape index: {}]   ;;  %s4764_s17 = inlined_call_operand.vmem [shape: f32[2,24,7], index: 17, kind: output, shape index: {}]  }
   0x1   :  { %4768 = sst [smem:[#allocation2_spill]] %s4747_s0 }
   0x2   :  { %4769 = sst [smem:[#allocation3_spill]] %s4748_s1 }
   0x3 LB: > { %s3052_s25 = sadd.s32 4294967295, %s3940_s24   ;;  %p3056_p0 = scmp.ge.s32.totalorder %s3940_s24, 1  ;;  %s3940_s24 = sphi %s4040_s24, %s27_s24  }
   0x4   : > { %p487_p1 = scmp.lt.s32.totalorder %s3940_s24, 3 }
   0x6   : > { %p488_p2 = pnand %p3056_p0, %p487_p1 }
   0x7   : > { %p539_p3 = scmp.lt.s32.totalorder (!%p488_p2), %s3052_s25, 1  ;;  %vm554_vm0 = vcmask (!%p488_p2), 261120   ;;  %s4770_s29 = sld [smem:[#allocation2_spill]] (!%p488_p2)  ;;  %v622_v21 = vld [vmem:[%s4750_s3] sm:$0xff] (!%p488_p2)  ;;  %v623_v22 = vld [vmem:[%s4750_s3 + $0x8] sm:$0xff] (!%p488_p2)  ;;  %v624_v23 = vld [vmem:[%s4750_s3 + $0x10] sm:$0xff] (!%p488_p2) }
   0x8   : > { %491 = sbr.rel (%p488_p2) target bundleno = 5977 (0x1759), region = 88  ;;  %v3942_v24 = vmov (!%p488_p2), 0.0|0.0   ;;  %v3660_v25 = vpack.c.bf16 (!%p488_p2), %v623_v22, %v622_v21  ;;  %v625_v26 = vld [vmem:[%s4750_s3 + $0x18] sm:$0xff] (!%p488_p2)  ;;  %vm3943_vm1 = vmmov (!%p488_p2), 0   ;;  %v3944_v27 = vmov (!%p488_p2), 0.0   ;;  %s3945_s1 = smov (!%p488_p2), 96  }
   0x9   : > { %3659 = vmatprep.subr.bf16.mxu0 (!%p488_p2), %v3942_v24  ;;  %3328 = vmatprep.mubr.msk.f32.mxu0 (!%p488_p2), %vm3943_vm1, %v3944_v27  ;;  %v3663_v28 = vpack.c.bf16 (!%p488_p2), %v625_v26, %v624_v23  ;;  %v3060_v41 = vld [vmem:[%s4749_s2] ss:$0 sm:$0xff] (!%p488_p2)  ;;  %vm739_vm2 = vcmask (!%p488_p2), 130048   ;;  %vm838_vm5 = vcmask (!%p488_p2), 195584   ;;  %s3946_s20 = smov (!%p488_p2), 64   ;;  %s3947_s21 = smov (!%p488_p2), 80  }
   0xa   : > { %3665 = vmatprep.subr.bf16.mxu1 (!%p488_p2), %v3942_v24  ;;  %3343 = vmatprep.mubr.msk.f32.mxu1 (!%p488_p2), %vm3943_vm1, %v3944_v27  ;;  %v3061_v54 = vld [vmem:[%s4751_s4] ss:$0 sm:$0xff] (!%p488_p2)  ;;  %vm4119_vm3 = vmpackc.low (!%p488_p2), %vm739_vm2, %vm739_vm2  ;;  %s3948_s22 = smov (!%p488_p2), 112   ;;  %s4766_s23 = smov (!%p488_p2), 48   ;;  %vm2993_vm9 = vcmask (!%p488_p2), 56320  }
   0xb   : > { %3661 = vmatpush3.bf16.msra.mxu0 (!%p488_p2), %v3660_v25 }
   0xc   : > { %3662 = vmatprep.subr.bf16.mxu0 (!%p488_p2), %v3942_v24 }
   0xf   : > { %s4777_s25 = smov (!%p539_p3, %s3052_s25), 1  ;;  %3664 = vmatpush3.bf16.msra.mxu0 %v3663_v28 }
  0x10   : > { %s4765_s26 = smul.u32 24, %s4777_s25  ;;  %3669 = vmatprep.subr.bf16.mxu0 %v3942_v24 }
  0x11   : > { %s4775_s28 = smul.u32 24, %s4777_s25 }
  0x12   : > { %s543_s0 = scalar_lea.vmem %s4770_s29, %s4765_s26  ;;  %s4771_s29 = sld [smem:[#allocation3_spill]] }
  0x13   : > { %v549_v0 = vld [vmem:[%s543_s0] sm:$0xff]  ;;  %v551_v1 = vld [vmem:[%s543_s0 + $0x10] sm:$0xff]  ;;  %v550_v2 = vld [vmem:[%s543_s0 + $0x8] sm:$0xff]  ;;  %s548_s0 = scalar_lea.vmem %s4764_s17, %s4775_s28 }
  0x14   : > { %v555_v3 = vsel %vm554_vm0, %v549_v0, 0.0  ;;  %v561_v4 = vsel %vm554_vm0, %v551_v1, 0.0  ;;  %v558_v5 = vsel %vm554_vm0, %v550_v2, 0.0 }
  0x15   : > { %556 = vadd.xlane.f32.xlu0 %v555_v3  ;;  %562 = vadd.xlane.f32.xlu1 %v561_v4 }
  0x18   : > { %v3059_v39 = vld [vmem:[%s4771_s29] ss:$0 sm:$0xff] }
  0x19   : > { %559 = vadd.xlane.f32.xlu0 %v558_v5 }
  0xa2   : > { %v557_v6 = vpop.xlane.xlu0 %556  ;;  %v563_v7 = vpop.xlane.xlu1 %562 }
  0xa3   : > { %v565_v8 = vmul.f32 0.03125, %v557_v6  ;;  %v567_v9 = vmul.f32 0.03125, %v563_v7 }
  0xa5   : > { %v568_v10 = vsub.f32 %v549_v0, %v565_v8  ;;  %v570_v11 = vsub.f32 %v551_v1, %v567_v9  ;;  %v613_v8 = vlaneseq }
  0xa6   : > { %v560_v12 = vpop.xlane.xlu0 %559 }
  0xa7   : > { %v566_v13 = vmul.f32 0.03125, %v560_v12  ;;  %v571_v14 = vmul.f32 %v568_v10, %v568_v10  ;;  %v573_v15 = vmul.f32 %v570_v11, %v570_v11  ;;  %v4138_v9 = vshrl.u32 %v613_v8, 7 }
  0xa9   : > { %v569_v16 = vsub.f32 %v550_v2, %v566_v13  ;;  %v574_v17 = vsel %vm554_vm0, %v571_v14, 0.0  ;;  %v580_v18 = vsel %vm554_vm0, %v573_v15, 0.0 }
  0xaa   : > { %575 = vadd.xlane.f32.xlu1 %v574_v17 }
  0xab   : > { %v572_v19 = vmul.f32 %v569_v16, %v569_v16 }
  0xad   : > { %v577_v20 = vsel %vm554_vm0, %v572_v19, 0.0 }
  0xae   : > { %581 = vadd.xlane.f32.xlu1 %v580_v18  ;;  %578 = vadd.xlane.f32.xlu0 %v577_v20 }
 0x137   : > { %v576_v29 = vpop.xlane.xlu1 %575 }
 0x138   : > { %v583_v30 = vmul.f32 0.03125, %v576_v29 }
 0x13a   : > { %v586_v31 = vadd.f32 1e-05, %v583_v30 }
 0x13b   : > { %v582_v32 = vpop.xlane.xlu1 %581  ;;  %v579_v33 = vpop.xlane.xlu0 %578 }
 0x13c   : > { %3838 = vrsqrt.f32 %v586_v31  ;;  %v585_v34 = vmul.f32 0.03125, %v582_v32  ;;  %v584_v35 = vmul.f32 0.03125, %v579_v33 }
 0x13e   : > { %v588_v36 = vadd.f32 1e-05, %v585_v34  ;;  %v587_v37 = vadd.f32 1e-05, %v584_v35 }
 0x140   : > { %3840 = vrsqrt.f32 %v588_v36 }
 0x141   : > { %3842 = vrsqrt.f32 %v587_v37 }
 0x146   : > { %v3839_v38 = vpop.eup %3838 }
 0x147   : > { %v592_v40 = vmul.f32 %v3839_v38, %v568_v10  ;;  %v4140_v10 = vand.u32 127, %v613_v8 }
 0x149   : > { %v601_v42 = vmul.f32 %v3059_v39, %v592_v40  ;;  %vm619_vm4 = vcmp.ge.s32.totalorder %v4138_v9, %v4140_v10  ;;  %vm2986_vm8 = vcmp.ge.s32.totalorder %v4140_v10, 5 }
 0x14a   : > { %v3841_v43 = vpop.eup %3840 }
 0x14b   : > { %v3843_v44 = vpop.eup %3842  ;;  %v4088_v45 = vadd.f32 %v3060_v41, %v601_v42  ;;  %v594_v47 = vmul.f32 %v3841_v43, %v570_v11  ;;  %v4145_v11 = vadd.s32 8, %v4138_v9 }
 0x14c   : > { %v593_v46 = vmul.f32 %v3843_v44, %v569_v16  ;;  %v4154_v16 = vadd.s32 16, %v4138_v9 }
 0x14d   : > { %3329 = vmatmul.mubr.msk.f32.vlgmr.msra.gmra.mrb[0].mxu0 %vm554_vm0, %v4088_v45  ;;  %v603_v50 = vmul.f32 %v3059_v39, %v594_v47  ;;  %vm620_vm6 = vcmp.ge.s32.totalorder %v4145_v11, %v4140_v10 }
 0x14e   : > { %3331 = vmatprep.mubr.msk.f32.mxu0 %vm3943_vm1, %v3944_v27  ;;  %v602_v48 = vmul.f32 %v3059_v39, %v593_v46  ;;  %vm621_vm7 = vcmp.ge.s32.totalorder %v4154_v16, %v4140_v10 }
 0x14f   : > { %v4100_v51 = vadd.f32 %v3060_v41, %v603_v50 }
 0x150   : > { %v4094_v49 = vadd.f32 %v3060_v41, %v602_v48 }
 0x152   : > { %3332 = vmatmul.mubr.msk.f32.gmra.mrb[2].mxu0 %vm554_vm0, %v4094_v49 }
 0x153   : > { %3334 = vmatprep.mubr.msk.f32.mxu0 %vm3943_vm1, %v3944_v27 }
 0x156   : > { %3335 = vmatmul.mubr.msk.f32.gmra.mrb[4].mxu0 %vm554_vm0, %v4100_v51 }
 0x157   : > { %3358 = vmatprep.mubr.msk.f32.mxu0 %vm3943_vm1, %v3944_v27 }
 0x220   : > { %v713_v52 = vpop.f32.mrb[0].mxu0 }
 0x221   : > { %v3330_v53 = vpop.f32.mrb[1].mxu0  ;;  %v714_v56 = vadd.f32 %v3061_v54, %v713_v52 }
 0x223   : > { %v727_v5 = vmul.f32 0.25, %v714_v56 }
 0x225   : > { %v718_v55 = vpop.f32.mrb[2].mxu0 }
 0x226   : > { %v719_v57 = vadd.f32 %v3061_v54, %v718_v55  ;;  %v3333_v58 = vpop.f32.mrb[3].mxu0 }
 0x228   : > { %v4109_v59 = vpack.i.bf16 %v719_v57, %v714_v56  ;;  %v728_v6 = vmul.f32 0.25, %v719_v57 }
 0x229   : > { %v723_v60 = vpop.f32.mrb[4].mxu0 }
 0x22a   : > { %v4111_v61 = vadd.f32 %v3061_v54, %v723_v60  ;;  %3799 = vrot.lane.b32.xlu0 %v4109_v59, %s3945_s1  ;;  %v3336_v62 = vpop.f32.mrb[5].mxu0 }
 0x22c   : > { %737 = vrot.lane.b32.xlu1 %v4111_v61, %s3945_s1  ;;  %v729_v7 = vmul.f32 0.25, %v4111_v61 }
 0x29c   : > { %v3800_v63 = vpop.permute.xlu0 %3799 }
 0x29d   : > { %v3802_v0 = vunpack.i.h.bf16 %v3800_v63  ;;  %v3801_v1 = vunpack.i.l.bf16 %v3800_v63 }
 0x29e   : > { %v738_v4 = vpop.permute.xlu1 %737 }
 0x29f   : > { %v3666_v3 = vpack.c.bf16 %v3802_v0, %v3801_v1 }
 0x2a1   : > { %3668 = vmatpush3.bf16.xpose.msk.msra.mxu1 %vm4119_vm3, %v3666_v3 }
 0x2a2   : > { %3341 = vmatprep.subr.mxu1 %v3944_v27 }
 0x2a9   : > { %3342 = vmatpush3.xpose.msk.msra.mxu1 %vm739_vm2, %v738_v4 }
 0x2aa   : > { %3777 = vmatprep.subr.bf16.mxu1 %v3942_v24 }
 0x2ac   : > { %3344 = vmatmul.mubr.msk.f32.vlgmr.msra.gmra.mrb[0].mxu1 %vm739_vm2, %v727_v5 }
 0x2ad   : > { %3346 = vmatprep.mubr.msk.f32.mxu1 %vm3943_vm1, %v3944_v27 }
 0x2b0   : > { %3347 = vmatmul.mubr.msk.f32.gmra.mrb[2].mxu1 %vm739_vm2, %v728_v6 }
 0x2b1   : > { %3349 = vmatprep.mubr.msk.f32.mxu1 %vm3943_vm1, %v3944_v27 }
 0x2b4   : > { %3350 = vmatmul.mubr.msk.f32.gmra.mrb[4].mxu1 %vm739_vm2, %v729_v7 }
 0x2b5   : > { %3379 = vmatprep.mubr.msk.f32.mxu1 %vm3943_vm1, %v3944_v27 }
 0x37f   : > { %v821_v12 = vpop.f32.mrb[0].mxu1 }
 0x380   : > { %v835_v13 = vsel %vm619_vm4, %v821_v12, -1e+30  ;;  %v3345_v14 = vpop.f32.mrb[1].mxu1 }
 0x381   : > { %v839_v15 = vsel %vm838_vm5, %v835_v13, -inf }
 0x382   : > { %840 = vmax.xlane.f32.xlu1 %v839_v15 }
 0x383   : > { %v826_v17 = vpop.f32.mrb[2].mxu1 }
 0x384   : > { %v836_v18 = vsel %vm620_vm6, %v826_v17, -1e+30  ;;  %v3348_v19 = vpop.f32.mrb[3].mxu1 }
 0x385   : > { %v842_v20 = vsel %vm838_vm5, %v836_v18, -inf }
 0x386   : > { %843 = vmax.xlane.f32.xlu0 %v842_v20 }
 0x387   : > { %v831_v21 = vpop.f32.mrb[4].mxu1 }
 0x388   : > { %v837_v22 = vsel %vm621_vm7, %v831_v21, -1e+30  ;;  %v3351_v23 = vpop.f32.mrb[5].mxu1 }
 0x389   : > { %v845_v25 = vsel %vm838_vm5, %v837_v22, -inf }
 0x38a   : > { %846 = vmax.xlane.f32.xlu0 %v845_v25 }
 0x40f   : > { %v841_v26 = vpop.xlane.xlu1 %840 }
 0x410   : > { %v848_v28 = vsub.f32 %v835_v13, %v841_v26 }
 0x412   : > { %v851_v29 = vmul.f32 1.442695, %v848_v28 }
 0x413   : > { %v844_v30 = vpop.xlane.xlu0 %843 }
 0x414   : > { %3844 = vpow2.f32 %v851_v29  ;;  %v849_v31 = vsub.f32 %v836_v18, %v844_v30 }
 0x416   : > { %v853_v32 = vmul.f32 1.442695, %v849_v31 }
 0x417   : > { %v847_v37 = vpop.xlane.xlu0 %846 }
 0x418   : > { %3846 = vpow2.f32 %v853_v32  ;;  %v850_v38 = vsub.f32 %v837_v22, %v847_v37 }
 0x41a   : > { %v855_v39 = vmul.f32 1.442695, %v850_v38 }
 0x41c   : > { %3848 = vpow2.f32 %v855_v39 }
 0x41e   : > { %v3845_v33 = vpop.eup %3844 }
 0x41f   : > { %v857_v34 = vsel %vm838_vm5, %v3845_v33, 0.0 }
 0x420   : > { %858 = vadd.xlane.f32.xlu1 %v857_v34 }
 0x422   : > { %v3847_v35 = vpop.eup %3846 }
 0x423   : > { %v860_v36 = vsel %vm838_vm5, %v3847_v35, 0.0 }
 0x424   : > { %861 = vadd.xlane.f32.xlu0 %v860_v36 }
 0x426   : > { %v3849_v40 = vpop.eup %3848 }
 0x427   : > { %v863_v41 = vsel %vm838_vm5, %v3849_v40, 0.0 }
 0x431   : > { %876 = vrot.lane.b32.xlu1 %v4111_v61, %s3946_s20 }
 0x435   : > { %3809 = vrot.lane.b32.xlu1 %v4109_v59, %s3947_s21 }
 0x439   : > { %980 = vrot.lane.b32.xlu1 %v4111_v61, %s3947_s21 }
 0x43a   : > { %3804 = vrot.lane.b32.xlu0 %v4109_v59, %s3946_s20 }
 0x43e   : > { %970 = vrot.lane.b32.xlu0 %v727_v5, %s3948_s22 }
 0x442   : > { %974 = vrot.lane.b32.xlu0 %v729_v7, %s3948_s22 }
 0x45d   : > { %864 = vadd.xlane.f32.xlu1 %v863_v41 }
 0x46e   : > { %972 = vrot.lane.b32.xlu1 %v728_v6, %s3948_s22 }
 0x4ad   : > { %v859_v42 = vpop.xlane.xlu1 %858 }
 0x4ae   : > { %3850 = vrcp.f32 %v859_v42 }
 0x4b1   : > { %v877_v43 = vpop.permute.xlu1 %876  ;;  %v862_v44 = vpop.xlane.xlu0 %861 }
 0x4b2   : > { %3852 = vrcp.f32 %v862_v44 }
 0x4b5   : > { %v3810_v46 = vpop.permute.xlu1 %3809  ;;  %v3805_v47 = vpop.permute.xlu0 %3804 }
 0x4b6   : > { %v3812_v48 = vunpack.i.h.bf16 %v3810_v46  ;;  %v3811_v50 = vunpack.i.l.bf16 %v3810_v46  ;;  %v3807_v52 = vunpack.i.h.bf16 %v3805_v47  ;;  %v3806_v53 = vunpack.i.l.bf16 %v3805_v47  ;;  %v629_v46 = vld [vmem:[%s4752_s5 + $0x10] sm:$0xff]  ;;  %v630_v47 = vld [vmem:[%s4752_s5 + $0x18] sm:$0xff] }
 0x4b8   : > { %v3673_v54 = vpack.c.bf16 %v3812_v48, %v3811_v50  ;;  %v3670_v55 = vpack.c.bf16 %v3807_v52, %v3806_v53  ;;  %v3851_v56 = vpop.eup %3850  ;;  %v3680_v48 = vpack.c.bf16 %v630_v47, %v629_v46 }
 0x4b9   : > { %v869_v57 = vmul.f32 %v3851_v56, %v3845_v33  ;;  %v971_v60 = vpop.permute.xlu0 %970  ;;  %v981_v62 = vpop.permute.xlu1 %980 }
 0x4ba   : > { %3671 = vmatpush3.bf16.msra.mxu0 %v3670_v55  ;;  %3779 = vmatpush3.bf16.xpose.msk.msra.mxu1 %vm4119_vm3, %v3673_v54 }
 0x4bb   : > { %3356 = vmatprep.subr.mxu0 %v3944_v27  ;;  %3778 = vmatprep.subr.mxu1 %v3944_v27 }
 0x4bc   : > { %v3853_v58 = vpop.eup %3852 }
 0x4bd   : > { %v870_v63 = vmul.f32 %v3853_v58, %v3847_v35  ;;  %v975_v0 = vpop.permute.xlu0 %974  ;;  %v628_v58 = vld [vmem:[%s4752_s5 + $0x8] sm:$0xff] }
 0x4be   : > { %3357 = vmatpush3.msra.mxu0 %v877_v43 }
 0x4bf   : > { %3359 = vmatmul.mubr.msk.f32.vlgmr.msra.gmra.mrb[6].mxu0 %vm838_vm5, %v869_v57  ;;  %3672 = vmatprep.subr.bf16.mxu0 %v3942_v24  ;;  %v627_v57 = vld [vmem:[%s4752_s5] sm:$0xff] }
 0x4c0   : > { %3361 = vmatprep.mubr.msk.f32.mxu0 %vm3943_vm1, %v3944_v27 }
 0x4c2   : > { %3780 = vmatpush3.xpose.msk.msra.mxu1 %vm739_vm2, %v981_v62 }
 0x4c3   : > { %3362 = vmatmul.mubr.msk.f32.gmra.mrb[8].mxu0 %vm838_vm5, %v870_v63  ;;  %3679 = vmatprep.subr.bf16.mxu1 %v3942_v24 }
 0x4c4   : > { %3364 = vmatprep.mubr.msk.f32.mxu0 %vm3943_vm1, %v3944_v27 }
 0x4c5   : > { %3675 = vmatpush3.bf16.xpose.msk.msra.mxu0 %vm4119_vm3, %v3673_v54  ;;  %3380 = vmatmul.mubr.msk.f32.vlgmr.msra.gmra.mrb[6].mxu1 %vm739_vm2, %v975_v0 }
 0x4c6   : > { %3371 = vmatprep.subr.mxu0 %v3944_v27  ;;  %3401 = vmatprep.mubr.msk.f32.mxu1 %vm3943_vm1, %v3944_v27 }
 0x4c7   : > { %3681 = vmatpush3.bf16.msra.mxu1 %v3680_v48 }
 0x4c8   : > { %3685 = vmatprep.subr.bf16.mxu1 %v3942_v24 }
 0x4cd   : > { %3372 = vmatpush3.xpose.msk.msra.mxu0 %vm739_vm2, %v981_v62  ;;  %v3683_v62 = vpack.c.bf16 %v628_v58, %v627_v57  ;;  %v1459_v58 = vld [vmem:[%s4756_s9 + $0x10] sm:$0xff] }
 0x4ce   : > { %3676 = vmatprep.subr.bf16.mxu0 %v3942_v24 }
 0x4ea   : > { %v865_v1 = vpop.xlane.xlu1 %864 }
 0x4eb   : > { %3854 = vrcp.f32 %v865_v1 }
 0x4ee   : > { %v973_v5 = vpop.permute.xlu1 %972 }
 0x4f5   : > { %v3855_v3 = vpop.eup %3854 }
 0x4f6   : > { %v871_v4 = vmul.f32 %v3855_v3, %v3849_v40 }
 0x4f8   : > { %3365 = vmatmul.mubr.msk.f32.gmra.mrb[10].mxu0 %vm838_vm5, %v871_v4 }
 0x4f9   : > { %3373 = vmatprep.mubr.msk.f32.mxu0 %vm3943_vm1, %v3944_v27 }
 0x4fc   : > { %3374 = vmatmul.mubr.msk.f32.vlgmr.msra.gmra.mrb[12].mxu0 %vm739_vm2, %v971_v60 }
 0x4fd   : > { %3376 = vmatprep.mubr.msk.f32.mxu0 %vm3943_vm1, %v3944_v27 }
 0x500   : > { %3377 = vmatmul.mubr.msk.f32.gmra.mrb[14].mxu0 %vm739_vm2, %v973_v5 }
 0x501   : > { %3388 = vmatprep.mubr.msk.f32.mxu0 %vm3943_vm1, %v3944_v27 }
 0x592   : > { %v4210_v6 = vpop.f32.mrb[6].mxu0 }
 0x593   : > { %v3360_v7 = vpop.f32.mrb[7].mxu0 }
 0x596   : > { %v4212_v8 = vpop.f32.mrb[8].mxu0 }
 0x597   : > { %v3363_v12 = vpop.f32.mrb[9].mxu0 }
 0x598   : > { %v1070_v13 = vpop.f32.mrb[6].mxu1 }
 0x599   : > { %v3381_v14 = vpop.f32.mrb[7].mxu1  ;;  %v1076_v28 = vsel %vm621_vm7, %v1070_v13, -1e+30 }
 0x59a   : > { %v1083_v29 = vsel %vm838_vm5, %v1076_v28, -inf }
 0x5cb   : > { %v4214_v15 = vpop.f32.mrb[10].mxu0 }
 0x5cc   : > { %v3366_v17 = vpop.f32.mrb[11].mxu0 }
 0x5cf   : > { %v1060_v18 = vpop.f32.mrb[12].mxu0 }
 0x5d0   : > { %v1074_v19 = vsel %vm619_vm4, %v1060_v18, -1e+30  ;;  %v3375_v20 = vpop.f32.mrb[13].mxu0 }
 0x5d1   : > { %v1077_v21 = vsel %vm838_vm5, %v1074_v19, -inf }
 0x5d2   : > { %1078 = vmax.xlane.f32.xlu1 %v1077_v21  ;;  %v3089_v21 = vld [vmem:[%s4753_s6] ss:$0 sm:$0xff] }
 0x5d3   : > { %v1065_v22 = vpop.f32.mrb[14].mxu0 }
 0x5d4   : > { %v1075_v23 = vsel %vm620_vm6, %v1065_v22, -1e+30  ;;  %v3378_v25 = vpop.f32.mrb[15].mxu0 }
 0x5d5   : > { %v1080_v26 = vsel %vm838_vm5, %v1075_v23, -inf }
 0x5d6   : > { %1081 = vmax.xlane.f32.xlu0 %v1080_v26 }
 0x5da   : > { %1084 = vmax.xlane.f32.xlu0 %v1083_v29 }
 0x65f   : > { %v1079_v30 = vpop.xlane.xlu1 %1078 }
 0x660   : > { %v1086_v33 = vsub.f32 %v1074_v19, %v1079_v30 }
 0x662   : > { %v1089_v37 = vmul.f32 1.442695, %v1086_v33 }
 0x663   : > { %v1082_v31 = vpop.xlane.xlu0 %1081 }
 0x664   : > { %v1087_v32 = vsub.f32 %v1075_v23, %v1082_v31 }
 0x666   : > { %v1091_v34 = vmul.f32 1.442695, %v1087_v32 }
 0x667   : > { %v1085_v35 = vpop.xlane.xlu0 %1084 }
 0x668   : > { %3856 = vpow2.f32 %v1091_v34  ;;  %v1088_v36 = vsub.f32 %v1076_v28, %v1085_v35 }
 0x66a   : > { %v1093_v38 = vmul.f32 1.442695, %v1088_v36 }
 0x66c   : > { %3858 = vpow2.f32 %v1093_v38 }
 0x66d   : > { %3860 = vpow2.f32 %v1089_v37 }
 0x672   : > { %v3857_v39 = vpop.eup %3856 }
 0x673   : > { %v1098_v40 = vsel %vm838_vm5, %v3857_v39, 0.0 }
 0x674   : > { %1099 = vadd.xlane.f32.xlu1 %v1098_v40 }
 0x676   : > { %v3859_v41 = vpop.eup %3858 }
 0x677   : > { %v1101_v42 = vsel %vm838_vm5, %v3859_v41, 0.0  ;;  %v3861_v43 = vpop.eup %3860 }
 0x678   : > { %1102 = vadd.xlane.f32.xlu0 %v1101_v42  ;;  %v1095_v44 = vsel %vm838_vm5, %v3861_v43, 0.0 }
 0x67c   : > { %1096 = vadd.xlane.f32.xlu0 %v1095_v44 }
 0x685   : > { %3814 = vrot.lane.b32.xlu1 %v4109_v59, %s4766_s23 }
 0x692   : > { %1114 = vrot.lane.b32.xlu0 %v4111_v61, %s4766_s23 }
 0x701   : > { %v1100_v50 = vpop.xlane.xlu1 %1099 }
 0x705   : > { %v3815_v52 = vpop.permute.xlu1 %3814  ;;  %v1103_v53 = vpop.xlane.xlu0 %1102 }
 0x706   : > { %v3817_v54 = vunpack.i.h.bf16 %v3815_v52  ;;  %v3816_v59 = vunpack.i.l.bf16 %v3815_v52 }
 0x708   : > { %v3677_v55 = vpack.c.bf16 %v3817_v54, %v3816_v59 }
 0x709   : > { %v1097_v56 = vpop.xlane.xlu0 %1096 }
 0x70a   : > { %3862 = vrcp.f32 %v1097_v56  ;;  %3678 = vmatpush3.bf16.msra.mxu0 %v3677_v55  ;;  %v1457_v56 = vld [vmem:[%s4756_s9] sm:$0xff] }
 0x70b   : > { %3386 = vmatprep.subr.mxu0 %v3944_v27  ;;  %3864 = vrcp.f32 %v1100_v50 }
 0x70c   : > { %3866 = vrcp.f32 %v1103_v53 }
 0x70d   : > { %v1115_v61 = vpop.permute.xlu0 %1114 }
 0x70e   : > { %3387 = vmatpush3.msra.mxu0 %v1115_v61  ;;  %v1458_v61 = vld [vmem:[%s4756_s9 + $0x8] sm:$0xff] }
 0x70f   : > { %3682 = vmatprep.subr.bf16.mxu0 %v3942_v24  ;;  %v3686_v57 = vpack.c.bf16 %v1458_v61, %v1457_v56 }
 0x714   : > { %v3863_v60 = vpop.eup %3862 }
 0x715   : > { %v1107_v63 = vmul.f32 %v3863_v60, %v3861_v43  ;;  %v3865_v0 = vpop.eup %3864  ;;  %v1460_v60 = vld [vmem:[%s4756_s9 + $0x18] sm:$0xff] }
 0x716   : > { %v1108_v1 = vmul.f32 %v3865_v0, %v3857_v39  ;;  %v3867_v3 = vpop.eup %3866  ;;  %v1585_v0 = vld [vmem:[%s4758_s11 + $0x8] sm:$0xff] }
 0x717   : > { %3389 = vmatmul.mubr.msk.f32.vlgmr.msra.gmra.mrb[16].mxu0 %vm838_vm5, %v1107_v63  ;;  %v1109_v4 = vmul.f32 %v3867_v3, %v3859_v41  ;;  %v1584_v63 = vld [vmem:[%s4758_s11] sm:$0xff] }
 0x718   : > { %3391 = vmatprep.mubr.msk.f32.mxu0 %vm3943_vm1, %v3944_v27  ;;  %3684 = vmatpush3.bf16.msra.mxu0 %v3683_v62  ;;  %v3689_v62 = vpack.c.bf16 %v1460_v60, %v1459_v58 }
 0x719   : > { %3691 = vmatprep.subr.bf16.mxu0 %v3942_v24 }
 0x71b   : > { %3392 = vmatmul.mubr.msk.f32.gmra.mrb[18].mxu0 %vm838_vm5, %v1108_v1  ;;  %v3692_v1 = vpack.c.bf16 %v1585_v0, %v1584_v63 }
 0x71c   : > { %3394 = vmatprep.mubr.msk.f32.mxu0 %vm3943_vm1, %v3944_v27 }
 0x71f   : > { %3395 = vmatmul.mubr.msk.f32.gmra.mrb[20].mxu0 %vm838_vm5, %v1109_v4 }
 0x720   : > { %3414 = vmatprep.mubr.msk.f32.mxu0 %vm3943_vm1, %v3944_v27 }
 0x723   : > { %3415 = vmatmul.mubr.msk.f32.vlgmr.msra.gmra.mrb[22].mxu0 %vm739_vm2, %v4210_v6 }
 0x724   : > { %3417 = vmatprep.mubr.msk.f32.mxu0 %vm3943_vm1, %v3944_v27  ;;  %3693 = vmatpush3.bf16.msra.mxu0 %v3692_v1 }
 0x725   : > { %3694 = vmatprep.subr.bf16.mxu0 %v3942_v24 }
 0x727   : > { %3418 = vmatmul.mubr.msk.f32.gmra.mrb[24].mxu0 %vm739_vm2, %v4212_v8 }
 0x728   : > { %3420 = vmatprep.mubr.msk.f32.mxu0 %vm3943_vm1, %v3944_v27 }
 0x72b   : > { %3421 = vmatmul.mubr.msk.f32.gmra.mrb[26].mxu0 %vm739_vm2, %v4214_v15 }
 0x72c   : > { %3472 = vmatprep.mubr.msk.f32.mxu0 %vm3943_vm1, %v3944_v27 }
 0x7ea   : > { %v1194_v5 = vpop.f32.mrb[16].mxu0 }
 0x7eb   : > { %v3390_v7 = vpop.f32.mrb[17].mxu0  ;;  %3402 = vmatmul.mubr.msk.f32.vlgmr.msra.gmra.mrb[8].mxu1 %vm739_vm2, %v1194_v5 }
 0x7ec   : > { %3404 = vmatprep.mubr.msk.f32.mxu1 %vm3943_vm1, %v3944_v27  ;;  %3687 = vmatpush3.bf16.msra.mxu1 %v3686_v57 }
 0x7ed   : > { %3688 = vmatprep.subr.bf16.mxu1 %v3942_v24 }
 0x7ee   : > { %v1199_v6 = vpop.f32.mrb[18].mxu0 }
 0x7ef   : > { %v3393_v12 = vpop.f32.mrb[19].mxu0  ;;  %3405 = vmatmul.mubr.msk.f32.gmra.mrb[10].mxu1 %vm739_vm2, %v1199_v6 }
 0x7f0   : > { %3407 = vmatprep.mubr.msk.f32.mxu1 %vm3943_vm1, %v3944_v27  ;;  %3690 = vmatpush3.bf16.msra.mxu1 %v3689_v62 }
 0x7f1   : > { %3715 = vmatprep.subr.bf16.mxu1 %v3942_v24 }
 0x7f2   : > { %v1204_v8 = vpop.f32.mrb[20].mxu0 }
 0x7f3   : > { %v3396_v13 = vpop.f32.mrb[21].mxu0  ;;  %3408 = vmatmul.mubr.msk.f32.gmra.mrb[12].mxu1 %vm739_vm2, %v1204_v8 }
 0x7f4   : > { %3431 = vmatprep.mubr.msk.f32.mxu1 %vm3943_vm1, %v3944_v27 }
 0x7f6   : > { %v1372_v14 = vpop.f32.mrb[22].mxu0 }
 0x7f7   : > { %v3416_v15 = vpop.f32.mrb[23].mxu0 }
 0x7fa   : > { %v1377_v17 = vpop.f32.mrb[24].mxu0 }
 0x7fb   : > { %v3419_v18 = vpop.f32.mrb[25].mxu0 }
 0x7fe   : > { %v1382_v19 = vpop.f32.mrb[26].mxu0 }
 0x7ff   : > { %v3422_v20 = vpop.f32.mrb[27].mxu0 }
 0x8be   : > { %v1283_v22 = vpop.f32.mrb[8].mxu1 }
 0x8bf   : > { %v1373_v23 = vadd.f32 %v1372_v14, %v1283_v22  ;;  %v3403_v25 = vpop.f32.mrb[9].mxu1 }
 0x8c1   : > { %v1392_v26 = vadd.f32 %v3089_v21, %v1373_v23 }
 0x8c2   : > { %v1288_v28 = vpop.f32.mrb[10].mxu1 }
 0x8c3   : > { %v1378_v29 = vadd.f32 %v1377_v17, %v1288_v28  ;;  %v3406_v30 = vpop.f32.mrb[11].mxu1  ;;  %v1395_v31 = vadd.f32 %v1392_v26, %v4088_v45  ;;  %v3090_v17 = vld [vmem:[%s4754_s7] ss:$0 sm:$0xff] }
 0x8c5   : > { %v1393_v32 = vadd.f32 %v3089_v21, %v1378_v29  ;;  %v1400_v33 = vsel %vm554_vm0, %v1395_v31, 0.0 }
 0x8c6   : > { %v1293_v34 = vpop.f32.mrb[12].mxu1  ;;  %1401 = vadd.xlane.f32.xlu1 %v1400_v33  ;;  %v1587_v33 = vld [vmem:[%s4758_s11 + $0x18] sm:$0xff] }
 0x8c7   : > { %v1383_v35 = vadd.f32 %v1382_v19, %v1293_v34  ;;  %v3409_v36 = vpop.f32.mrb[13].mxu1  ;;  %v1396_v37 = vadd.f32 %v1393_v32, %v4094_v49  ;;  %v3091_v19 = vld [vmem:[%s4755_s8] ss:$0 sm:$0xff]  ;;  %v1586_v32 = vld [vmem:[%s4758_s11 + $0x10] sm:$0xff] }
 0x8c8   : > { %v3695_v34 = vpack.c.bf16 %v1587_v33, %v1586_v32  ;;  %v1589_v36 = vld [vmem:[%s4758_s11 + $0x28] sm:$0xff] }
 0x8c9   : > { %v1394_v38 = vadd.f32 %v3089_v21, %v1383_v35  ;;  %v1403_v39 = vsel %vm554_vm0, %v1396_v37, 0.0  ;;  %v1588_v35 = vld [vmem:[%s4758_s11 + $0x20] sm:$0xff] }
 0x8ca   : > { %1404 = vadd.xlane.f32.xlu0 %v1403_v39  ;;  %3696 = vmatpush3.bf16.msra.mxu0 %v3695_v34  ;;  %v1591_v39 = vld [vmem:[%s4758_s11 + $0x38] sm:$0xff] }
 0x8cb   : > { %v1397_v40 = vadd.f32 %v1394_v38, %v4100_v51  ;;  %3697 = vmatprep.subr.bf16.mxu0 %v3942_v24  ;;  %v1590_v38 = vld [vmem:[%s4758_s11 + $0x30] sm:$0xff] }
 0x8cd   : > { %v1406_v41 = vsel %vm554_vm0, %v1397_v40, 0.0 }
 0x8ce   : > { %1407 = vadd.xlane.f32.xlu1 %v1406_v41  ;;  %v1592_v41 = vld [vmem:[%s4758_s11 + $0x40] sm:$0xff] }
 0x953   : > { %v1402_v42 = vpop.xlane.xlu1 %1401 }
 0x954   : > { %v1409_v45 = vmul.f32 0.03125, %v1402_v42  ;;  %v1593_v42 = vld [vmem:[%s4758_s11 + $0x48] sm:$0xff] }
 0x956   : > { %v1412_v43 = vsub.f32 %v1395_v31, %v1409_v45  ;;  %v3704_v45 = vpack.c.bf16 %v1593_v42, %v1592_v41 }
 0x957   : > { %v1405_v44 = vpop.xlane.xlu0 %1404 }
 0x958   : > { %v1410_v46 = vmul.f32 0.03125, %v1405_v44  ;;  %v1415_v47 = vmul.f32 %v1412_v43, %v1412_v43  ;;  %v1595_v44 = vld [vmem:[%s4758_s11 + $0x58] sm:$0xff] }
 0x95a   : > { %v1413_v48 = vsub.f32 %v1396_v37, %v1410_v46  ;;  %v1418_v50 = vsel %vm554_vm0, %v1415_v47, 0.0  ;;  %v3698_v37 = vpack.c.bf16 %v1589_v36, %v1588_v35  ;;  %v1596_v47 = vld [vmem:[%s4758_s11 + $0x60] sm:$0xff] }
 0x95b   : > { %1419 = vadd.xlane.f32.xlu0 %v1418_v50  ;;  %v1408_v49 = vpop.xlane.xlu1 %1407  ;;  %v3096_v36 = vld [vmem:[%s4759_s12] ss:$0 sm:$0xff] }
 0x95c   : > { %v1411_v52 = vmul.f32 0.03125, %v1408_v49  ;;  %v1416_v53 = vmul.f32 %v1413_v48, %v1413_v48  ;;  %3699 = vmatpush3.bf16.msra.mxu0 %v3698_v37  ;;  %v1598_v49 = vld [vmem:[%s4758_s11 + $0x70] sm:$0xff] }
 0x95d   : > { %3700 = vmatprep.subr.bf16.mxu0 %v3942_v24 }
 0x95e   : > { %v1414_v54 = vsub.f32 %v1397_v40, %v1411_v52  ;;  %v1421_v59 = vsel %vm554_vm0, %v1416_v53, 0.0  ;;  %v3701_v40 = vpack.c.bf16 %v1591_v39, %v1590_v38  ;;  %v1599_v52 = vld [vmem:[%s4758_s11 + $0x78] sm:$0xff] }
 0x95f   : > { %1422 = vadd.xlane.f32.xlu1 %v1421_v59  ;;  %v3713_v53 = vpack.c.bf16 %v1599_v52, %v1598_v49 }
 0x960   : > { %v1417_v51 = vmul.f32 %v1414_v54, %v1414_v54  ;;  %3702 = vmatpush3.bf16.msra.mxu0 %v3701_v40 }
 0x961   : > { %3703 = vmatprep.subr.bf16.mxu0 %v3942_v24 }
 0x962   : > { %v1424_v55 = vsel %vm554_vm0, %v1417_v51, 0.0 }
 0x963   : > { %1425 = vadd.xlane.f32.xlu0 %v1424_v55 }
 0x964   : > { %3705 = vmatpush3.bf16.msra.mxu0 %v3704_v45 }
 0x965   : > { %3706 = vmatprep.subr.bf16.mxu0 %v3942_v24 }
 0x9e8   : > { %v1420_v3 = vpop.xlane.xlu0 %1419 }
 0x9e9   : > { %v1427_v4 = vmul.f32 0.03125, %v1420_v3 }
 0x9eb   : > { %v1430_v5 = vadd.f32 1e-05, %v1427_v4 }
 0x9ec   : > { %v1423_v7 = vpop.xlane.xlu1 %1422 }
 0x9ed   : > { %3868 = vrsqrt.f32 %v1430_v5  ;;  %v1428_v6 = vmul.f32 0.03125, %v1423_v7 }
 0x9ef   : > { %v1431_v12 = vadd.f32 1e-05, %v1428_v6 }
 0x9f0   : > { %v1426_v8 = vpop.xlane.xlu0 %1425 }
 0x9f1   : > { %3870 = vrsqrt.f32 %v1431_v12  ;;  %v1429_v13 = vmul.f32 0.03125, %v1426_v8 }
 0x9f3   : > { %v1432_v14 = vadd.f32 1e-05, %v1429_v13 }
 0x9f5   : > { %3872 = vrsqrt.f32 %v1432_v14 }
 0x9f7   : > { %v3869_v15 = vpop.eup %3868 }
 0x9f8   : > { %v1436_v18 = vmul.f32 %v3869_v15, %v1412_v43  ;;  %v1594_v43 = vld [vmem:[%s4758_s11 + $0x50] sm:$0xff] }
 0x9f9   : > { %v3707_v46 = vpack.c.bf16 %v1595_v44, %v1594_v43 }
 0x9fa   : > { %v1445_v20 = vmul.f32 %v3090_v17, %v1436_v18 }
 0x9fb   : > { %v3871_v21 = vpop.eup %3870  ;;  %3708 = vmatpush3.bf16.msra.mxu0 %v3707_v46 }
 0x9fc   : > { %v4320_v22 = vadd.f32 %v3091_v19, %v1445_v20  ;;  %v1437_v23 = vmul.f32 %v3871_v21, %v1413_v48  ;;  %v1597_v48 = vld [vmem:[%s4758_s11 + $0x68] sm:$0xff]  ;;  %3709 = vmatprep.subr.bf16.mxu0 %v3942_v24 }
 0x9fd   : > { %v3710_v50 = vpack.c.bf16 %v1597_v48, %v1596_v47 }
 0x9fe   : > { %3432 = vmatmul.mubr.msk.f32.vlgmr.msra.gmra.mrb[14].mxu1 %vm554_vm0, %v4320_v22  ;;  %v1446_v25 = vmul.f32 %v3090_v17, %v1437_v23 }
 0x9ff   : > { %v3873_v26 = vpop.eup %3872  ;;  %3434 = vmatprep.mubr.msk.f32.mxu1 %vm3943_vm1, %v3944_v27  ;;  %3711 = vmatpush3.bf16.msra.mxu0 %v3710_v50 }
 0xa00   : > { %v4326_v28 = vadd.f32 %v3091_v19, %v1446_v25  ;;  %v1438_v29 = vmul.f32 %v3873_v26, %v1414_v54  ;;  %3712 = vmatprep.subr.bf16.mxu0 %v3942_v24  ;;  %v3092_v54 = vld [vmem:[%s4757_s10] ss:$0 sm:$0xff] }
 0xa02   : > { %3435 = vmatmul.mubr.msk.f32.gmra.mrb[16].mxu1 %vm554_vm0, %v4326_v28  ;;  %v1447_v30 = vmul.f32 %v3090_v17, %v1438_v29 }
 0xa03   : > { %3437 = vmatprep.mubr.msk.f32.mxu1 %vm3943_vm1, %v3944_v27  ;;  %3714 = vmatpush3.bf16.msra.mxu0 %v3713_v53 }
 0xa04   : > { %v4332_v31 = vadd.f32 %v3091_v19, %v1447_v30  ;;  %3728 = vmatprep.subr.bf16.mxu0 %v3942_v24 }
 0xa06   : > { %3438 = vmatmul.mubr.msk.f32.gmra.mrb[18].mxu1 %vm554_vm0, %v4332_v31 }
 0xa07   : > { %3489 = vmatprep.mubr.msk.f32.mxu1 %vm3943_vm1, %v3944_v27 }
 0xad1   : > { %v1543_v59 = vpop.f32.mrb[14].mxu1 }
 0xad2   : > { %v1544_v51 = vadd.f32 %v3092_v54, %v1543_v59  ;;  %v3433_v55 = vpop.f32.mrb[15].mxu1 }
 0xad4   : > { %v1560_v56 = vmul.f32 0.044715, %v1544_v51  ;;  %v1557_v20 = vmul.f32 0.5, %v1544_v51 }
 0xad5   : > { %v1548_v61 = vpop.f32.mrb[16].mxu1 }
 0xad6   : > { %v1563_v57 = vmul.f32 %v1560_v56, %v1544_v51  ;;  %v1549_v58 = vadd.f32 %v3092_v54, %v1548_v61  ;;  %v3436_v60 = vpop.f32.mrb[17].mxu1 }
 0xad8   : > { %v1566_v62 = vmul.f32 %v1563_v57, %v1544_v51  ;;  %v1561_v63 = vmul.f32 0.044715, %v1549_v58  ;;  %v1558_v26 = vmul.f32 0.5, %v1549_v58 }
 0xad9   : > { %v1553_v0 = vpop.f32.mrb[18].mxu1 }
 0xada   : > { %v1569_v1 = vadd.f32 %v1566_v62, %v1544_v51  ;;  %v1564_v3 = vmul.f32 %v1561_v63, %v1549_v58  ;;  %v1554_v4 = vadd.f32 %v3092_v54, %v1553_v0  ;;  %v3439_v5 = vpop.f32.mrb[19].mxu1  ;;  %v3099_v0 = vld [vmem:[%s4750_s3 + $0x20] sm:$0xff] }
 0xadb   : > { %v3102_v5 = vld [vmem:[%s4750_s3 + $0x38] sm:$0xff] }
 0xadc   : > { %v1572_v7 = vmul.f32 0.7978846, %v1569_v1  ;;  %v1562_v6 = vmul.f32 0.044715, %v1554_v4  ;;  %v1567_v12 = vmul.f32 %v1564_v3, %v1549_v58  ;;  %v1559_v33 = vmul.f32 0.5, %v1554_v4  ;;  %v3100_v1 = vld [vmem:[%s4750_s3 + $0x28] sm:$0xff] }
 0xadd   : > { %v3716_v3 = vpack.c.bf16 %v3100_v1, %v3099_v0 }
 0xade   : > { %3874 = vtanh.f32 %v1572_v7  ;;  %v1565_v8 = vmul.f32 %v1562_v6, %v1554_v4  ;;  %v1570_v13 = vadd.f32 %v1567_v12, %v1549_v58 }
 0xadf   : > { %3717 = vmatpush3.bf16.msra.mxu1 %v3716_v3 }
 0xae0   : > { %v1573_v14 = vmul.f32 0.7978846, %v1570_v13  ;;  %v1568_v15 = vmul.f32 %v1565_v8, %v1554_v4  ;;  %3718 = vmatprep.subr.bf16.mxu1 %v3942_v24 }
 0xae2   : > { %3876 = vtanh.f32 %v1573_v14  ;;  %v1571_v17 = vadd.f32 %v1568_v15, %v1554_v4  ;;  %v3101_v4 = vld [vmem:[%s4750_s3 + $0x30] sm:$0xff] }
 0xae3   : > { %v3719_v7 = vpack.c.bf16 %v3102_v5, %v3101_v4 }
 0xae4   : > { %v1574_v18 = vmul.f32 0.7978846, %v1571_v17 }
 0xae5   : > { %3720 = vmatpush3.bf16.msra.mxu1 %v3719_v7 }
 0xae6   : > { %3878 = vtanh.f32 %v1574_v18  ;;  %3721 = vmatprep.subr.bf16.mxu1 %v3942_v24 }
 0xae8   : > { %v3875_v19 = vpop.eup %3874 }
 0xae9   : > { %v1578_v21 = vadd.f32 1.0, %v3875_v19 }
 0xaeb   : > { %v1581_v23 = vmul.f32 %v1578_v21, %v1557_v20  ;;  %v3097_v21 = vld [vmem:[%s4760_s13] ss:$0 sm:$0xff] }
 0xaec   : > { %v3877_v25 = vpop.eup %3876 }
 0xaed   : > { %3473 = vmatmul.mubr.f32.vlgmr.msra.gmra.mrb[28].mxu0 %v1581_v23  ;;  %v1579_v29 = vadd.f32 1.0, %v3877_v25  ;;  %v3098_v25 = vld [vmem:[%s4761_s14] ss:$0 sm:$0xff] }
 0xaee   : > { %3475 = vmatprep.mubr.msk.f32.mxu0 %vm3943_vm1, %v3944_v27 }
 0xaef   : > { %v1582_v30 = vmul.f32 %v1579_v29, %v1558_v26 }
 0xaf0   : > { %v3879_v32 = vpop.eup %3878 }
 0xaf1   : > { %3476 = vmatmul.mubr.f32.gmra.mrb[30].mxu0 %v1582_v30  ;;  %v1580_v34 = vadd.f32 1.0, %v3879_v32 }
 0xaf2   : > { %3478 = vmatprep.mubr.msk.f32.mxu0 %vm3943_vm1, %v3944_v27 }
 0xaf3   : > { %v1583_v35 = vmul.f32 %v1580_v34, %v1559_v33 }
 0xaf5   : > { %3479 = vmatmul.mubr.f32.gmra.mrb[32].mxu0 %v1583_v35 }
 0xaf6   : > { %3534 = vmatprep.mubr.msk.f32.mxu0 %vm3943_vm1, %v3944_v27 }
 0xbc0   : > { %v1673_v37 = vpop.f32.mrb[28].mxu0 }
 0xbc1   : > { %v1674_v38 = vadd.f32 %v3096_v36, %v1673_v37  ;;  %v3474_v39 = vpop.f32.mrb[29].mxu0 }
 0xbc3   : > { %v1687_v40 = vadd.f32 %v1674_v38, %v4320_v22 }
 0xbc4   : > { %v1678_v41 = vpop.f32.mrb[30].mxu0 }
 0xbc5   : > { %v1679_v42 = vadd.f32 %v3096_v36, %v1678_v41  ;;  %v3477_v45 = vpop.f32.mrb[31].mxu0  ;;  %v1692_v43 = vsel %vm554_vm0, %v1687_v40, 0.0  ;;  %v3109_v41 = vld [vmem:[%s4751_s4 + $0x1] ss:$0 sm:$0xff] }
 0xbc6   : > { %1693 = vadd.xlane.f32.xlu1 %v1692_v43 }
 0xbc7   : > { %v1688_v44 = vadd.f32 %v1679_v42, %v4326_v28 }
 0xbc8   : > { %v1683_v46 = vpop.f32.mrb[32].mxu0 }
 0xbc9   : > { %v1684_v47 = vadd.f32 %v3096_v36, %v1683_v46  ;;  %v3480_v48 = vpop.f32.mrb[33].mxu0  ;;  %v1695_v50 = vsel %vm554_vm0, %v1688_v44, 0.0 }
 0xbca   : > { %1696 = vadd.xlane.f32.xlu0 %v1695_v50 }
 0xbcb   : > { %v1689_v49 = vadd.f32 %v1684_v47, %v4332_v31 }
 0xbcd   : > { %v1698_v52 = vsel %vm554_vm0, %v1689_v49, 0.0 }
 0xbce   : > { %1699 = vadd.xlane.f32.xlu1 %v1698_v52 }
 0xc53   : > { %v1694_v22 = vpop.xlane.xlu1 %1693 }
 0xc54   : > { %v1701_v53 = vmul.f32 0.03125, %v1694_v22 }
 0xc56   : > { %v1704_v54 = vsub.f32 %v1687_v40, %v1701_v53 }
 0xc57   : > { %v1697_v59 = vpop.xlane.xlu0 %1696 }
 0xc58   : > { %v1702_v51 = vmul.f32 0.03125, %v1697_v59  ;;  %v1707_v55 = vmul.f32 %v1704_v54, %v1704_v54 }
 0xc5a   : > { %v1705_v56 = vsub.f32 %v1688_v44, %v1702_v51  ;;  %v1710_v28 = vsel %vm554_vm0, %v1707_v55, 0.0 }
 0xc5b   : > { %1711 = vadd.xlane.f32.xlu0 %v1710_v28  ;;  %v1700_v61 = vpop.xlane.xlu1 %1699 }
 0xc5c   : > { %v1703_v57 = vmul.f32 0.03125, %v1700_v61  ;;  %v1708_v58 = vmul.f32 %v1705_v56, %v1705_v56 }
 0xc5e   : > { %v1706_v60 = vsub.f32 %v1689_v49, %v1703_v57  ;;  %v1713_v62 = vsel %vm554_vm0, %v1708_v58, 0.0 }
 0xc5f   : > { %1714 = vadd.xlane.f32.xlu1 %v1713_v62 }
 0xc60   : > { %v1709_v31 = vmul.f32 %v1706_v60, %v1706_v60 }
 0xc62   : > { %v1716_v63 = vsel %vm554_vm0, %v1709_v31, 0.0 }
 0xc63   : > { %1717 = vadd.xlane.f32.xlu0 %v1716_v63 }
 0xce8   : > { %v1712_v6 = vpop.xlane.xlu0 %1711 }
 0xce9   : > { %v1719_v12 = vmul.f32 0.03125, %v1712_v6 }
 0xceb   : > { %v1722_v8 = vadd.f32 1e-05, %v1719_v12 }
 0xcec   : > { %v1715_v13 = vpop.xlane.xlu1 %1714 }
 0xced   : > { %3880 = vrsqrt.f32 %v1722_v8  ;;  %v1720_v14 = vmul.f32 0.03125, %v1715_v13 }
 0xcef   : > { %v1723_v15 = vadd.f32 1e-05, %v1720_v14 }
 0xcf0   : > { %v1718_v17 = vpop.xlane.xlu0 %1717 }
 0xcf1   : > { %3882 = vrsqrt.f32 %v1723_v15  ;;  %v1721_v18 = vmul.f32 0.03125, %v1718_v17 }
 0xcf3   : > { %v1724_v19 = vadd.f32 1e-05, %v1721_v18 }
 0xcf5   : > { %3884 = vrsqrt.f32 %v1724_v19 }
 0xcf7   : > { %v3881_v20 = vpop.eup %3880 }
 0xcf8   : > { %v1728_v23 = vmul.f32 %v3881_v20, %v1704_v54 }
 0xcfa   : > { %v1737_v26 = vmul.f32 %v3097_v21, %v1728_v23 }
 0xcfb   : > { %v3883_v29 = vpop.eup %3882 }
 0xcfc   : > { %v4428_v30 = vadd.f32 %v3098_v25, %v1737_v26  ;;  %v1729_v32 = vmul.f32 %v3883_v29, %v1705_v56 }
 0xcfe   : > { %3490 = vmatmul.mubr.msk.f32.vlgmr.msra.gmra.mrb[20].mxu1 %vm554_vm0, %v4428_v30  ;;  %v1738_v33 = vmul.f32 %v3097_v21, %v1729_v32 }
 0xcff   : > { %v3885_v34 = vpop.eup %3884  ;;  %3492 = vmatprep.mubr.msk.f32.mxu1 %vm3943_vm1, %v3944_v27 }
 0xd00   : > { %v4434_v35 = vadd.f32 %v3098_v25, %v1738_v33  ;;  %v1730_v36 = vmul.f32 %v3885_v34, %v1706_v60 }
 0xd02   : > { %3493 = vmatmul.mubr.msk.f32.gmra.mrb[22].mxu1 %vm554_vm0, %v4434_v35  ;;  %v1739_v37 = vmul.f32 %v3097_v21, %v1730_v36 }
 0xd03   : > { %3495 = vmatprep.mubr.msk.f32.mxu1 %vm3943_vm1, %v3944_v27 }
 0xd04   : > { %v4440_v38 = vadd.f32 %v3098_v25, %v1739_v37 }
 0xd06   : > { %3496 = vmatmul.mubr.msk.f32.gmra.mrb[24].mxu1 %vm554_vm0, %v4440_v38 }
 0xd07   : > { %3504 = vmatprep.mubr.msk.f32.mxu1 %vm3943_vm1, %v3944_v27 }
 0xdd1   : > { %v1844_v39 = vpop.f32.mrb[20].mxu1 }
 0xdd2   : > { %v3491_v40 = vpop.f32.mrb[21].mxu1  ;;  %v1845_v45 = vadd.f32 %v3109_v41, %v1844_v39 }
 0xdd4   : > { %v1858_v52 = vmul.f32 0.25, %v1845_v45 }
 0xdd5   : > { %v1849_v42 = vpop.f32.mrb[22].mxu1 }
 0xdd6   : > { %v1850_v43 = vadd.f32 %v3109_v41, %v1849_v42  ;;  %v3494_v44 = vpop.f32.mrb[23].mxu1 }
 0xdd8   : > { %v4449_v46 = vpack.i.bf16 %v1850_v43, %v1845_v45  ;;  %v1859_v49 = vmul.f32 0.25, %v1850_v43 }
 0xdd9   : > { %v1854_v47 = vpop.f32.mrb[24].mxu1 }
 0xdda   : > { %v4451_v48 = vadd.f32 %v3109_v41, %v1854_v47  ;;  %3819 = vrot.lane.b32.xlu1 %v4449_v46, %s3945_s1  ;;  %v3497_v50 = vpop.f32.mrb[25].mxu1 }
 0xddc   : > { %1868 = vrot.lane.b32.xlu0 %v4451_v48, %s3945_s1  ;;  %v1860_v22 = vmul.f32 0.25, %v4451_v48  ;;  %s4774_s1 = smov 48  }
 0xdde   : > { %3824 = vrot.lane.b32.xlu1 %v4449_v46, %s3947_s21 }
 0xde0   : > { %2101 = vrot.lane.b32.xlu0 %v1859_v49, %s3948_s22 }
 0xde2   : > { %2109 = vrot.lane.b32.xlu1 %v4451_v48, %s3947_s21 }
 0xde6   : > { %2099 = vrot.lane.b32.xlu1 %v1858_v52, %s3948_s22 }
 0xdea   : > { %2103 = vrot.lane.b32.xlu1 %v1860_v22, %s3948_s22 }
 0xe4c   : > { %v3820_v53 = vpop.permute.xlu1 %3819 }
 0xe4d   : > { %v3822_v54 = vunpack.i.h.bf16 %v3820_v53  ;;  %v3821_v59 = vunpack.i.l.bf16 %v3820_v53 }
 0xe4e   : > { %v1869_v57 = vpop.permute.xlu0 %1868 }
 0xe4f   : > { %v3722_v51 = vpack.c.bf16 %v3822_v54, %v3821_v59 }
 0xe50   : > { %v3825_v55 = vpop.permute.xlu1 %3824 }
 0xe51   : > { %v3827_v56 = vunpack.i.h.bf16 %v3825_v55  ;;  %v3826_v28 = vunpack.i.l.bf16 %v3825_v55  ;;  %3724 = vmatpush3.bf16.xpose.msk.msra.mxu1 %vm4119_vm3, %v3722_v51 }
 0xe52   : > { %3502 = vmatprep.subr.mxu1 %v3944_v27  ;;  %v2102_v2 = vpop.permute.xlu0 %2101 }
 0xe53   : > { %v3729_v61 = vpack.c.bf16 %v3827_v56, %v3826_v28 }
 0xe54   : > { %v2110_v58 = vpop.permute.xlu1 %2109 }
 0xe55   : > { %3731 = vmatpush3.bf16.xpose.msk.msra.mxu0 %vm4119_vm3, %v3729_v61 }
 0xe56   : > { %3532 = vmatprep.subr.mxu0 %v3944_v27 }
 0xe58   : > { %v2100_v60 = vpop.permute.xlu1 %2099 }
 0xe59   : > { %3503 = vmatpush3.xpose.msk.msra.mxu1 %vm739_vm2, %v1869_v57 }
 0xe5a   : > { %3725 = vmatprep.subr.bf16.mxu1 %v3942_v24 }
 0xe5c   : > { %3505 = vmatmul.mubr.msk.f32.vlgmr.msra.gmra.mrb[26].mxu1 %vm739_vm2, %v1858_v52  ;;  %v2104_v62 = vpop.permute.xlu1 %2103 }
 0xe5d   : > { %3533 = vmatpush3.xpose.msk.msra.mxu0 %vm739_vm2, %v2110_v58  ;;  %3507 = vmatprep.mubr.msk.f32.mxu1 %vm3943_vm1, %v3944_v27 }
 0xe5e   : > { %3735 = vmatprep.subr.bf16.mxu0 %v3942_v24 }
 0xe60   : > { %3508 = vmatmul.mubr.msk.f32.gmra.mrb[28].mxu1 %vm739_vm2, %v1859_v49  ;;  %3535 = vmatmul.mubr.msk.f32.vlgmr.msra.gmra.mrb[34].mxu0 %vm739_vm2, %v2100_v60 }
 0xe61   : > { %3510 = vmatprep.mubr.msk.f32.mxu1 %vm3943_vm1, %v3944_v27  ;;  %3537 = vmatprep.mubr.msk.f32.mxu0 %vm3943_vm1, %v3944_v27 }
 0xe64   : > { %3511 = vmatmul.mubr.msk.f32.gmra.mrb[30].mxu1 %vm739_vm2, %v1860_v22  ;;  %3538 = vmatmul.mubr.msk.f32.gmra.mrb[36].mxu0 %vm739_vm2, %v2102_v2 }
 0xe65   : > { %3540 = vmatprep.mubr.msk.f32.mxu0 %vm3943_vm1, %v3944_v27  ;;  %3519 = vmatprep.mubr.msk.f32.mxu1 %vm3943_vm1, %v3944_v27 }
 0xe68   : > { %3541 = vmatmul.mubr.msk.f32.gmra.mrb[38].mxu0 %vm739_vm2, %v2104_v62 }
 0xe69   : > { %3562 = vmatprep.mubr.msk.f32.mxu0 %vm3943_vm1, %v3944_v27 }
 0xf2f   : > { %v1951_v31 = vpop.f32.mrb[26].mxu1 }
 0xf30   : > { %v1965_v63 = vsel %vm619_vm4, %v1951_v31, -1e+30  ;;  %v3506_v0 = vpop.f32.mrb[27].mxu1 }
 0xf31   : > { %v1968_v1 = vsel %vm838_vm5, %v1965_v63, -inf }
 0xf32   : > { %1969 = vmax.xlane.f32.xlu0 %v1968_v1 }
 0xf33   : > { %v1956_v3 = vpop.f32.mrb[28].mxu1  ;;  %v2189_v4 = vpop.f32.mrb[34].mxu0 }
 0xf34   : > { %v1966_v5 = vsel %vm620_vm6, %v1956_v3, -1e+30  ;;  %v3509_v7 = vpop.f32.mrb[29].mxu1  ;;  %v3536_v6 = vpop.f32.mrb[35].mxu0  ;;  %v2203_v19 = vsel %vm619_vm4, %v2189_v4, -1e+30 }
 0xf35   : > { %v1971_v12 = vsel %vm838_vm5, %v1966_v5, -inf  ;;  %v2206_v25 = vsel %vm838_vm5, %v2203_v19, -inf }
 0xf36   : > { %1972 = vmax.xlane.f32.xlu1 %v1971_v12 }
 0xf37   : > { %v1961_v8 = vpop.f32.mrb[30].mxu1  ;;  %v2194_v13 = vpop.f32.mrb[36].mxu0 }
 0xf38   : > { %v1967_v14 = vsel %vm621_vm7, %v1961_v8, -1e+30  ;;  %v3512_v15 = vpop.f32.mrb[31].mxu1  ;;  %v3539_v17 = vpop.f32.mrb[37].mxu0  ;;  %v2204_v29 = vsel %vm620_vm6, %v2194_v13, -1e+30 }
 0xf39   : > { %v1974_v18 = vsel %vm838_vm5, %v1967_v14, -inf  ;;  %v2209_v9 = vsel %vm838_vm5, %v2204_v29, -inf }
 0xf3a   : > { %1975 = vmax.xlane.f32.xlu0 %v1974_v18 }
 0xf3b   : > { %v2199_v20 = vpop.f32.mrb[38].mxu0 }
 0xf3c   : > { %v2205_v21 = vsel %vm621_vm7, %v2199_v20, -1e+30  ;;  %v3542_v23 = vpop.f32.mrb[39].mxu0 }
 0xf3d   : > { %v2212_v26 = vsel %vm838_vm5, %v2205_v21, -inf  ;;  %v3105_v23 = vld [vmem:[%s4752_s5 + $0x28] sm:$0xff] }
 0xf3e   : > { %2207 = vmax.xlane.f32.xlu0 %v2206_v25  ;;  %2213 = vmax.xlane.f32.xlu1 %v2212_v26 }
 0xf42   : > { %2210 = vmax.xlane.f32.xlu0 %v2209_v9 }
 0xf4f   : > { %3829 = vrot.lane.b32.xlu1 %v4449_v46, %s3946_s20 }
 0xfbf   : > { %v1970_v32 = vpop.xlane.xlu0 %1969 }
 0xfc0   : > { %v1977_v16 = vsub.f32 %v1965_v63, %v1970_v32 }
 0xfc2   : > { %v1980_v33 = vmul.f32 1.442695, %v1977_v16 }
 0xfc3   : > { %v1973_v34 = vpop.xlane.xlu1 %1972 }
 0xfc4   : > { %3886 = vpow2.f32 %v1980_v33  ;;  %v1978_v37 = vsub.f32 %v1966_v5, %v1973_v34  ;;  %v3106_v34 = vld [vmem:[%s4752_s5 + $0x30] sm:$0xff] }
 0xfc6   : > { %v1982_v11 = vmul.f32 1.442695, %v1978_v37 }
 0xfc7   : > { %v1976_v36 = vpop.xlane.xlu0 %1975 }
 0xfc8   : > { %v1979_v45 = vsub.f32 %v1967_v14, %v1976_v36  ;;  %v3107_v36 = vld [vmem:[%s4752_s5 + $0x38] sm:$0xff] }
 0xfc9   : > { %v3736_v37 = vpack.c.bf16 %v3107_v36, %v3106_v34  ;;  %v3151_v34 = vld [vmem:[%s4758_s11 + $0x80] sm:$0xff]  ;;  %v3152_v36 = vld [vmem:[%s4758_s11 + $0x88] sm:$0xff] }
 0xfca   : > { %v1984_v53 = vmul.f32 1.442695, %v1979_v45 }
 0xfcb   : > { %v2208_v39 = vpop.xlane.xlu0 %2207  ;;  %v2214_v40 = vpop.xlane.xlu1 %2213  ;;  %3737 = vmatpush3.bf16.msra.mxu0 %v3736_v37  ;;  %v3748_v37 = vpack.c.bf16 %v3152_v36, %v3151_v34 }
 0xfcc   : > { %v2215_v41 = vsub.f32 %v2203_v19, %v2208_v39  ;;  %v2217_v54 = vsub.f32 %v2205_v21, %v2214_v40  ;;  %v3104_v21 = vld [vmem:[%s4752_s5 + $0x20] sm:$0xff]  ;;  %3741 = vmatprep.subr.bf16.mxu0 %v3942_v24 }
 0xfcd   : > { %v3739_v26 = vpack.c.bf16 %v3105_v23, %v3104_v21 }
 0xfce   : > { %v3887_v42 = vpop.eup %3886  ;;  %v2218_v43 = vmul.f32 1.442695, %v2215_v41  ;;  %v2222_v55 = vmul.f32 1.442695, %v2217_v54 }
 0xfcf   : > { %v2211_v44 = vpop.xlane.xlu0 %2210  ;;  %v3830_v47 = vpop.permute.xlu1 %3829  ;;  %v1986_v50 = vsel %vm838_vm5, %v3887_v42, 0.0 }
 0xfd0   : > { %3888 = vpow2.f32 %v2218_v43  ;;  %v2216_v49 = vsub.f32 %v2204_v29, %v2211_v44  ;;  %v3832_v52 = vunpack.i.h.bf16 %v3830_v47  ;;  %v3831_v22 = vunpack.i.l.bf16 %v3830_v47  ;;  %1987 = vadd.xlane.f32.xlu0 %v1986_v50 }
 0xfd1   : > { %3890 = vpow2.f32 %v1982_v11 }
 0xfd2   : > { %v2220_v59 = vmul.f32 1.442695, %v2216_v49  ;;  %v3726_v51 = vpack.c.bf16 %v3832_v52, %v3831_v22 }
 0xfd4   : > { %3892 = vpow2.f32 %v2220_v59  ;;  %3727 = vmatpush3.bf16.msra.mxu1 %v3726_v51 }
 0xfd5   : > { %3517 = vmatprep.subr.mxu1 %v3944_v27  ;;  %3894 = vpow2.f32 %v1984_v53 }
 0xfd6   : > { %3896 = vpow2.f32 %v2222_v55 }
 0xfda   : > { %v3889_v56 = vpop.eup %3888 }
 0xfdb   : > { %v3891_v28 = vpop.eup %3890  ;;  %v2224_v61 = vsel %vm838_vm5, %v3889_v56, 0.0 }
 0xfdc   : > { %2225 = vadd.xlane.f32.xlu1 %v2224_v61  ;;  %v1989_v60 = vsel %vm838_vm5, %v3891_v28, 0.0 }
 0xfde   : > { %v3893_v57 = vpop.eup %3892 }
 0xfdf   : > { %v2227_v58 = vsel %vm838_vm5, %v3893_v57, 0.0  ;;  %v3895_v2 = vpop.eup %3894 }
 0xfe0   : > { %2228 = vadd.xlane.f32.xlu0 %v2227_v58  ;;  %1990 = vadd.xlane.f32.xlu1 %v1989_v60  ;;  %v1992_v62 = vsel %vm838_vm5, %v3895_v2, 0.0  ;;  %v3897_v31 = vpop.eup %3896 }
 0xfe1   : > { %v2230_v63 = vsel %vm838_vm5, %v3897_v31, 0.0 }
 0xfe4   : > { %1993 = vadd.xlane.f32.xlu0 %v1992_v62 }
 0xfe8   : > { %2231 = vadd.xlane.f32.xlu0 %v2230_v63 }
 0xff1   : > { %3834 = vrot.lane.b32.xlu1 %v4449_v46, %s4774_s1 }
 0xff5   : > { %2243 = vrot.lane.b32.xlu1 %v4451_v48, %s4774_s1 }
 0xffe   : > { %2005 = vrot.lane.b32.xlu0 %v4451_v48, %s3946_s20 }
0x105d   : > { %v1988_v0 = vpop.xlane.xlu0 %1987 }
0x105e   : > { %3898 = vrcp.f32 %v1988_v0 }
0x1068   : > { %v3899_v12 = vpop.eup %3898 }
0x1069   : > { %v2226_v1 = vpop.xlane.xlu1 %2225  ;;  %v1998_v46 = vmul.f32 %v3899_v12, %v3887_v42 }
0x106d   : > { %v2229_v3 = vpop.xlane.xlu0 %2228  ;;  %v1991_v4 = vpop.xlane.xlu1 %1990 }
0x106e   : > { %3900 = vrcp.f32 %v1991_v4 }
0x1071   : > { %v1994_v5 = vpop.xlane.xlu0 %1993  ;;  %v3835_v7 = vpop.permute.xlu1 %3834 }
0x1072   : > { %3902 = vrcp.f32 %v1994_v5  ;;  %v3837_v8 = vunpack.i.h.bf16 %v3835_v7  ;;  %v3836_v13 = vunpack.i.l.bf16 %v3835_v7 }
0x1073   : > { %3904 = vrcp.f32 %v2226_v1 }
0x1074   : > { %v3733_v17 = vpack.c.bf16 %v3837_v8, %v3836_v13  ;;  %3906 = vrcp.f32 %v2229_v3 }
0x1075   : > { %v2232_v6 = vpop.xlane.xlu0 %2231  ;;  %v2244_v19 = vpop.permute.xlu1 %2243 }
0x1076   : > { %3908 = vrcp.f32 %v2232_v6 }
0x1078   : > { %v3901_v15 = vpop.eup %3900 }
0x1079   : > { %v2006_v14 = vpop.permute.xlu0 %2005  ;;  %v1999_v48 = vmul.f32 %v3901_v15, %v3891_v28 }
0x107a   : > { %3518 = vmatpush3.msra.mxu1 %v2006_v14 }
0x107b   : > { %3520 = vmatmul.mubr.msk.f32.vlgmr.msra.gmra.mrb[32].mxu1 %vm838_vm5, %v1998_v46  ;;  %3732 = vmatprep.subr.bf16.mxu1 %v3942_v24 }
0x107c   : > { %3734 = vmatpush3.bf16.msra.mxu1 %v3733_v17  ;;  %3522 = vmatprep.mubr.msk.f32.mxu1 %vm3943_vm1, %v3944_v27  ;;  %v3903_v18 = vpop.eup %3902 }
0x107d   : > { %3547 = vmatprep.subr.mxu1 %v3944_v27  ;;  %v2000_v20 = vmul.f32 %v3903_v18, %v3895_v2  ;;  %v3905_v25 = vpop.eup %3904 }
0x107e   : > { %v2236_v29 = vmul.f32 %v3905_v25, %v3889_v56  ;;  %v3907_v9 = vpop.eup %3906  ;;  %v3137_v56 = vld [vmem:[%s4753_s6 + $0x1] ss:$0 sm:$0xff] }
0x107f   : > { %3523 = vmatmul.mubr.msk.f32.gmra.mrb[34].mxu1 %vm838_vm5, %v1999_v48  ;;  %v2237_v32 = vmul.f32 %v3907_v9, %v3893_v57 }
0x1080   : > { %3548 = vmatpush3.msra.mxu1 %v2244_v19  ;;  %3525 = vmatprep.mubr.msk.f32.mxu1 %vm3943_vm1, %v3944_v27  ;;  %v3909_v16 = vpop.eup %3908 }
0x1081   : > { %3738 = vmatprep.subr.bf16.mxu1 %v3942_v24  ;;  %v2238_v33 = vmul.f32 %v3909_v16, %v3897_v31  ;;  %v3145_v16 = vld [vmem:[%s4756_s9 + $0x38] sm:$0xff] }
0x1083   : > { %3526 = vmatmul.mubr.msk.f32.gmra.mrb[36].mxu1 %vm838_vm5, %v2000_v20 }
0x1084   : > { %3549 = vmatprep.mubr.msk.f32.mxu1 %vm3943_vm1, %v3944_v27 }
0x1087   : > { %3550 = vmatmul.mubr.msk.f32.vlgmr.msra.gmra.mrb[38].mxu1 %vm838_vm5, %v2236_v29  ;;  %v3143_v29 = vld [vmem:[%s4756_s9 + $0x28] sm:$0xff] }
0x1088   : > { %3552 = vmatprep.mubr.msk.f32.mxu1 %vm3943_vm1, %v3944_v27  ;;  %3740 = vmatpush3.bf16.msra.mxu1 %v3739_v26  ;;  %v3142_v26 = vld [vmem:[%s4756_s9 + $0x20] sm:$0xff] }
0x1089   : > { %3747 = vmatprep.subr.bf16.mxu1 %v3942_v24  ;;  %v3742_v9 = vpack.c.bf16 %v3143_v29, %v3142_v26 }
0x108b   : > { %3553 = vmatmul.mubr.msk.f32.gmra.mrb[40].mxu1 %vm838_vm5, %v2237_v32  ;;  %v3144_v32 = vld [vmem:[%s4756_s9 + $0x30] sm:$0xff] }
0x108c   : > { %3555 = vmatprep.mubr.msk.f32.mxu1 %vm3943_vm1, %v3944_v27 }
0x108f   : > { %3556 = vmatmul.mubr.msk.f32.gmra.mrb[42].mxu1 %vm838_vm5, %v2238_v33  ;;  %v3745_v33 = vpack.c.bf16 %v3145_v16, %v3144_v32 }
0x1090   : > { %3575 = vmatprep.mubr.msk.f32.mxu1 %vm3943_vm1, %v3944_v27 }
0x114e   : > { %v2085_v39 = vpop.f32.mrb[32].mxu1 }
0x114f   : > { %v3521_v40 = vpop.f32.mrb[33].mxu1  ;;  %3576 = vmatmul.mubr.msk.f32.vlgmr.msra.gmra.mrb[44].mxu1 %vm739_vm2, %v2085_v39 }
0x1150   : > { %3578 = vmatprep.mubr.msk.f32.mxu1 %vm3943_vm1, %v3944_v27  ;;  %3749 = vmatpush3.bf16.msra.mxu1 %v3748_v37 }
0x1151   : > { %3750 = vmatprep.subr.bf16.mxu1 %v3942_v24 }
0x1152   : > { %v2090_v41 = vpop.f32.mrb[34].mxu1 }
0x1153   : > { %v3524_v11 = vpop.f32.mrb[35].mxu1  ;;  %3579 = vmatmul.mubr.msk.f32.gmra.mrb[46].mxu1 %vm739_vm2, %v2090_v41 }
0x1154   : > { %3581 = vmatprep.mubr.msk.f32.mxu1 %vm3943_vm1, %v3944_v27 }
0x1156   : > { %v2095_v42 = vpop.f32.mrb[36].mxu1 }
0x1157   : > { %v3527_v45 = vpop.f32.mrb[37].mxu1  ;;  %3582 = vmatmul.mubr.msk.f32.gmra.mrb[48].mxu1 %vm739_vm2, %v2095_v42 }
0x1158   : > { %3633 = vmatprep.mubr.msk.f32.mxu1 %vm3943_vm1, %v3944_v27 }
0x115a   : > { %v2323_v43 = vpop.f32.mrb[38].mxu1 }
0x115b   : > { %v3551_v44 = vpop.f32.mrb[39].mxu1  ;;  %3563 = vmatmul.mubr.msk.f32.vlgmr.msra.gmra.mrb[40].mxu0 %vm739_vm2, %v2323_v43 }
0x115c   : > { %3565 = vmatprep.mubr.msk.f32.mxu0 %vm3943_vm1, %v3944_v27  ;;  %3743 = vmatpush3.bf16.msra.mxu0 %v3742_v9 }
0x115d   : > { %3744 = vmatprep.subr.bf16.mxu0 %v3942_v24 }
0x115e   : > { %v2328_v47 = vpop.f32.mrb[40].mxu1 }
0x115f   : > { %v3554_v50 = vpop.f32.mrb[41].mxu1  ;;  %3566 = vmatmul.mubr.msk.f32.gmra.mrb[42].mxu0 %vm739_vm2, %v2328_v47 }
0x1160   : > { %3568 = vmatprep.mubr.msk.f32.mxu0 %vm3943_vm1, %v3944_v27  ;;  %3746 = vmatpush3.bf16.msra.mxu0 %v3745_v33 }
0x1161   : > { %3771 = vmatprep.subr.bf16.mxu0 %v3942_v24 }
0x1162   : > { %v2333_v49 = vpop.f32.mrb[42].mxu1 }
0x1163   : > { %v3557_v52 = vpop.f32.mrb[43].mxu1  ;;  %3569 = vmatmul.mubr.msk.f32.gmra.mrb[44].mxu0 %vm739_vm2, %v2333_v49  ;;  %v3140_v49 = vld [vmem:[%s4754_s7 + $0x1] ss:$0 sm:$0xff] }
0x1164   : > { %3592 = vmatprep.mubr.msk.f32.mxu0 %vm3943_vm1, %v3944_v27 }
0x1222   : > { %v2501_v22 = vpop.f32.mrb[44].mxu1 }
0x1223   : > { %v3577_v53 = vpop.f32.mrb[45].mxu1 }
0x1226   : > { %v2506_v54 = vpop.f32.mrb[46].mxu1 }
0x1227   : > { %v3580_v59 = vpop.f32.mrb[47].mxu1 }
0x122a   : > { %v2511_v51 = vpop.f32.mrb[48].mxu1 }
0x122b   : > { %v3583_v55 = vpop.f32.mrb[49].mxu1 }
0x122e   : > { %v2412_v28 = vpop.f32.mrb[40].mxu0 }
0x122f   : > { %v2502_v61 = vadd.f32 %v2501_v22, %v2412_v28  ;;  %v3564_v57 = vpop.f32.mrb[41].mxu0  ;;  %v3141_v22 = vld [vmem:[%s4755_s8 + $0x1] ss:$0 sm:$0xff] }
0x1231   : > { %v2521_v58 = vadd.f32 %v3137_v56, %v2502_v61 }
0x1232   : > { %v2417_v60 = vpop.f32.mrb[42].mxu0 }
0x1233   : > { %v2507_v2 = vadd.f32 %v2506_v54, %v2417_v60  ;;  %v3567_v62 = vpop.f32.mrb[43].mxu0  ;;  %v2524_v31 = vadd.f32 %v2521_v58, %v4428_v30  ;;  %v3153_v60 = vld [vmem:[%s4758_s11 + $0x90] sm:$0xff] }
0x1235   : > { %v2522_v63 = vadd.f32 %v3137_v56, %v2507_v2  ;;  %v2531_v0 = vsel %vm554_vm0, %v2524_v31, 0.0  ;;  %v3154_v2 = vld [vmem:[%s4758_s11 + $0x98] sm:$0xff] }
0x1236   : > { %2532 = vadd.xlane.f32.xlu1 %v2531_v0  ;;  %v2422_v1 = vpop.f32.mrb[44].mxu0  ;;  %v3751_v62 = vpack.c.bf16 %v3154_v2, %v3153_v60  ;;  %v3168_v60 = vld [vmem:[%s4759_s12 + $0x1] ss:$0 sm:$0xff] }
0x1237   : > { %v2512_v3 = vadd.f32 %v2511_v51, %v2422_v1  ;;  %v3570_v4 = vpop.f32.mrb[45].mxu0  ;;  %v2525_v5 = vadd.f32 %v2522_v63, %v4434_v35  ;;  %v3156_v63 = vld [vmem:[%s4758_s11 + $0xa8] sm:$0xff]  ;;  %v3157_v1 = vld [vmem:[%s4758_s11 + $0xb0] sm:$0xff] }
0x1238   : > { %3752 = vmatpush3.bf16.msra.mxu1 %v3751_v62 }
0x1239   : > { %v2523_v7 = vadd.f32 %v3137_v56, %v2512_v3  ;;  %v2534_v6 = vsel %vm554_vm0, %v2525_v5, 0.0  ;;  %3753 = vmatprep.subr.bf16.mxu1 %v3942_v24  ;;  %v3158_v3 = vld [vmem:[%s4758_s11 + $0xb8] sm:$0xff] }
0x123a   : > { %2535 = vadd.xlane.f32.xlu0 %v2534_v6  ;;  %v3757_v4 = vpack.c.bf16 %v3158_v3, %v3157_v1 }
0x123b   : > { %v2526_v12 = vadd.f32 %v2523_v7, %v4440_v38  ;;  %v3160_v7 = vld [vmem:[%s4758_s11 + $0xc8] sm:$0xff] }
0x123d   : > { %v2537_v8 = vsel %vm554_vm0, %v2526_v12, 0.0 }
0x123e   : > { %2538 = vadd.xlane.f32.xlu0 %v2537_v8  ;;  %v3162_v8 = vld [vmem:[%s4758_s11 + $0xd8] sm:$0xff] }
0x12c3   : > { %v2533_v13 = vpop.xlane.xlu1 %2532 }
0x12c4   : > { %v2540_v30 = vmul.f32 0.03125, %v2533_v13 }
0x12c6   : > { %v2543_v46 = vsub.f32 %v2524_v31, %v2540_v30  ;;  %v3155_v31 = vld [vmem:[%s4758_s11 + $0xa0] sm:$0xff] }
0x12c7   : > { %v2536_v14 = vpop.xlane.xlu0 %2535  ;;  %v3754_v0 = vpack.c.bf16 %v3156_v63, %v3155_v31  ;;  %v3163_v30 = vld [vmem:[%s4758_s11 + $0xe0] sm:$0xff] }
0x12c8   : > { %v2541_v15 = vmul.f32 0.03125, %v2536_v14  ;;  %v2546_v17 = vmul.f32 %v2543_v46, %v2543_v46 }
0x12c9   : > { %3755 = vmatpush3.bf16.msra.mxu1 %v3754_v0 }
0x12ca   : > { %v2544_v48 = vsub.f32 %v2525_v5, %v2541_v15  ;;  %v2549_v18 = vsel %vm554_vm0, %v2546_v17, 0.0  ;;  %3756 = vmatprep.subr.bf16.mxu1 %v3942_v24  ;;  %v3159_v5 = vld [vmem:[%s4758_s11 + $0xc0] sm:$0xff]  ;;  %v3165_v15 = vld [vmem:[%s4758_s11 + $0xf0] sm:$0xff]  ;;  %v3166_v17 = vld [vmem:[%s4758_s11 + $0xf8] sm:$0xff] }
0x12cb   : > { %2550 = vadd.xlane.f32.xlu1 %v2549_v18  ;;  %v2539_v35 = vpop.xlane.xlu0 %2538  ;;  %v3760_v6 = vpack.c.bf16 %v3160_v7, %v3159_v5  ;;  %v3147_v18 = vld [vmem:[%s4757_s10 + $0x1] ss:$0 sm:$0xff] }
0x12cc   : > { %v2542_v19 = vmul.f32 0.03125, %v2539_v35  ;;  %v2547_v20 = vmul.f32 %v2544_v48, %v2544_v48 }
0x12cd   : > { %3758 = vmatpush3.bf16.msra.mxu1 %v3757_v4 }
0x12ce   : > { %v2545_v21 = vsub.f32 %v2526_v12, %v2542_v19  ;;  %v2552_v23 = vsel %vm554_vm0, %v2547_v20, 0.0  ;;  %3759 = vmatprep.subr.bf16.mxu1 %v3942_v24  ;;  %v3161_v12 = vld [vmem:[%s4758_s11 + $0xd0] sm:$0xff] }
0x12cf   : > { %2553 = vadd.xlane.f32.xlu0 %v2552_v23  ;;  %v3763_v13 = vpack.c.bf16 %v3162_v8, %v3161_v12 }
0x12d0   : > { %v2548_v38 = vmul.f32 %v2545_v21, %v2545_v21 }
0x12d1   : > { %3761 = vmatpush3.bf16.msra.mxu1 %v3760_v6 }
0x12d2   : > { %v2555_v25 = vsel %vm554_vm0, %v2548_v38, 0.0  ;;  %3762 = vmatprep.subr.bf16.mxu1 %v3942_v24 }
0x12d3   : > { %2556 = vadd.xlane.f32.xlu1 %v2555_v25 }
0x12d5   : > { %3764 = vmatpush3.bf16.msra.mxu1 %v3763_v13 }
0x12d6   : > { %3765 = vmatprep.subr.bf16.mxu1 %v3942_v24 }
0x1358   : > { %v2551_v39 = vpop.xlane.xlu1 %2550 }
0x1359   : > { %v2558_v40 = vmul.f32 0.03125, %v2551_v39 }
0x135b   : > { %v2561_v41 = vadd.f32 1e-05, %v2558_v40 }
0x135c   : > { %v2554_v11 = vpop.xlane.xlu0 %2553 }
0x135d   : > { %3910 = vrsqrt.f32 %v2561_v41  ;;  %v2559_v42 = vmul.f32 0.03125, %v2554_v11 }
0x135f   : > { %v2562_v45 = vadd.f32 1e-05, %v2559_v42 }
0x1360   : > { %v2557_v43 = vpop.xlane.xlu1 %2556 }
0x1361   : > { %3912 = vrsqrt.f32 %v2562_v45  ;;  %v2560_v44 = vmul.f32 0.03125, %v2557_v43 }
0x1363   : > { %v2563_v47 = vadd.f32 1e-05, %v2560_v44 }
0x1365   : > { %3914 = vrsqrt.f32 %v2563_v47 }
0x1367   : > { %v3911_v50 = vpop.eup %3910 }
0x1368   : > { %v2567_v52 = vmul.f32 %v3911_v50, %v2543_v46  ;;  %v3164_v46 = vld [vmem:[%s4758_s11 + $0xe8] sm:$0xff] }
0x1369   : > { %v3766_v14 = vpack.c.bf16 %v3164_v46, %v3163_v30 }
0x136a   : > { %v2576_v53 = vmul.f32 %v3140_v49, %v2567_v52 }
0x136b   : > { %v3913_v54 = vpop.eup %3912  ;;  %3767 = vmatpush3.bf16.msra.mxu1 %v3766_v14 }
0x136c   : > { %v4624_v59 = vadd.f32 %v3141_v22, %v2576_v53  ;;  %v2568_v51 = vmul.f32 %v3913_v54, %v2544_v48  ;;  %v3769_v48 = vpack.c.bf16 %v3166_v17, %v3165_v15  ;;  %3768 = vmatprep.subr.bf16.mxu1 %v3942_v24 }
0x136e   : > { %3593 = vmatmul.mubr.msk.f32.vlgmr.msra.gmra.mrb[46].mxu0 %vm554_vm0, %v4624_v59  ;;  %v2577_v55 = vmul.f32 %v3140_v49, %v2568_v51 }
0x136f   : > { %v3915_v56 = vpop.eup %3914  ;;  %3595 = vmatprep.mubr.msk.f32.mxu0 %vm3943_vm1, %v3944_v27  ;;  %3770 = vmatpush3.bf16.msra.mxu1 %v3769_v48 }
0x1370   : > { %v4630_v28 = vadd.f32 %v3141_v22, %v2577_v55  ;;  %v2569_v61 = vmul.f32 %v3915_v56, %v2545_v21 }
0x1372   : > { %3596 = vmatmul.mubr.msk.f32.gmra.mrb[48].mxu0 %vm554_vm0, %v4630_v28  ;;  %v2578_v57 = vmul.f32 %v3140_v49, %v2569_v61 }
0x1373   : > { %3598 = vmatprep.mubr.msk.f32.mxu0 %vm3943_vm1, %v3944_v27 }
0x1374   : > { %v4636_v58 = vadd.f32 %v3141_v22, %v2578_v57 }
0x1376   : > { %3599 = vmatmul.mubr.msk.f32.gmra.mrb[50].mxu0 %vm554_vm0, %v4636_v58 }
0x1377   : > { %3650 = vmatprep.mubr.msk.f32.mxu0 %vm3943_vm1, %v3944_v27 }
0x1441   : > { %v2676_v35 = vpop.f32.mrb[46].mxu0 }
0x1442   : > { %v2677_v19 = vadd.f32 %v3147_v18, %v2676_v35  ;;  %v3594_v20 = vpop.f32.mrb[47].mxu0 }
0x1444   : > { %v2693_v21 = vmul.f32 0.044715, %v2677_v19  ;;  %v2690_v50 = vmul.f32 0.5, %v2677_v19 }
0x1445   : > { %v2681_v23 = vpop.f32.mrb[48].mxu0 }
0x1446   : > { %v2696_v38 = vmul.f32 %v2693_v21, %v2677_v19  ;;  %v2682_v25 = vadd.f32 %v3147_v18, %v2681_v23  ;;  %v3597_v26 = vpop.f32.mrb[49].mxu0 }
0x1447   : > { %v2887_v26 = vld [vmem:[%s4762_s15 + $0x8] sm:$0xff] }
0x1448   : > { %v2699_v29 = vmul.f32 %v2696_v38, %v2677_v19  ;;  %v2694_v9 = vmul.f32 0.044715, %v2682_v25  ;;  %v2691_v53 = vmul.f32 0.5, %v2682_v25 }
0x1449   : > { %v2686_v32 = vpop.f32.mrb[50].mxu0 }
0x144a   : > { %v2702_v16 = vadd.f32 %v2699_v29, %v2677_v19  ;;  %v2697_v33 = vmul.f32 %v2694_v9, %v2682_v25  ;;  %v2687_v34 = vadd.f32 %v3147_v18, %v2686_v32  ;;  %v3600_v36 = vpop.f32.mrb[51].mxu0  ;;  %v2888_v9 = vld [vmem:[%s4762_s15 + $0x10] sm:$0xff]  ;;  %v2889_v32 = vld [vmem:[%s4762_s15 + $0x18] sm:$0xff] }
0x144c   : > { %v2705_v37 = vmul.f32 0.7978846, %v2702_v16  ;;  %v2695_v39 = vmul.f32 0.044715, %v2687_v34  ;;  %v2700_v40 = vmul.f32 %v2697_v33, %v2682_v25  ;;  %v2692_v56 = vmul.f32 0.5, %v2687_v34 }
0x144d   : > { %v3775_v16 = vpack.c.bf16 %v2889_v32, %v2888_v9 }
0x144e   : > { %3916 = vtanh.f32 %v2705_v37  ;;  %v2698_v41 = vmul.f32 %v2695_v39, %v2687_v34  ;;  %v2703_v11 = vadd.f32 %v2700_v40, %v2682_v25  ;;  %v2886_v25 = vld [vmem:[%s4762_s15] sm:$0xff] }
0x144f   : > { %v3772_v29 = vpack.c.bf16 %v2887_v26, %v2886_v25 }
0x1450   : > { %v2706_v42 = vmul.f32 0.7978846, %v2703_v11  ;;  %v2701_v45 = vmul.f32 %v2698_v41, %v2687_v34 }
0x1451   : > { %3773 = vmatpush3.bf16.msra.mxu0 %v3772_v29 }
0x1452   : > { %3918 = vtanh.f32 %v2706_v42  ;;  %v2704_v43 = vadd.f32 %v2701_v45, %v2687_v34  ;;  %3774 = vmatprep.subr.bf16.mxu0 %v3942_v24  ;;  %v3171_v45 = vld [vmem:[%s4760_s13 + $0x1] ss:$0 sm:$0xff] }
0x1454   : > { %v2707_v44 = vmul.f32 0.7978846, %v2704_v43 }
0x1455   : > { %3776 = vmatpush3.bf16.msra.mxu0 %v3775_v16 }
0x1456   : > { %3920 = vtanh.f32 %v2707_v44  ;;  %v3172_v44 = vld [vmem:[%s4761_s14 + $0x1] ss:$0 sm:$0xff] }
0x1458   : > { %v3917_v47 = vpop.eup %3916 }
0x1459   : > { %v2711_v49 = vadd.f32 1.0, %v3917_v47 }
0x145b   : > { %v2714_v52 = vmul.f32 %v2711_v49, %v2690_v50 }
0x145c   : > { %v3919_v22 = vpop.eup %3918 }
0x145d   : > { %3634 = vmatmul.mubr.f32.vlgmr.msra.gmra.mrb[50].mxu1 %v2714_v52  ;;  %v2712_v54 = vadd.f32 1.0, %v3919_v22 }
0x145e   : > { %3636 = vmatprep.mubr.msk.f32.mxu1 %vm3943_vm1, %v3944_v27 }
0x145f   : > { %v2715_v51 = vmul.f32 %v2712_v54, %v2691_v53 }
0x1460   : > { %v3921_v55 = vpop.eup %3920 }
0x1461   : > { %3637 = vmatmul.mubr.f32.gmra.mrb[52].mxu1 %v2715_v51  ;;  %v2713_v61 = vadd.f32 1.0, %v3921_v55 }
0x1462   : > { %3639 = vmatprep.mubr.msk.f32.mxu1 %vm3943_vm1, %v3944_v27 }
0x1463   : > { %v2716_v57 = vmul.f32 %v2713_v61, %v2692_v56  ;;  %v3173_v61 = vld [vmem:[%s4763_s16] ss:$0 sm:$0xff] }
0x1465   : > { %3640 = vmatmul.mubr.f32.gmra.mrb[54].mxu1 %v2716_v57 }
0x1530   : > { %v2808_v2 = vpop.f32.mrb[50].mxu1 }
0x1531   : > { %v2809_v62 = vadd.f32 %v3168_v60, %v2808_v2  ;;  %v3635_v31 = vpop.f32.mrb[51].mxu1 }
0x1533   : > { %v2822_v63 = vadd.f32 %v2809_v62, %v4624_v59 }
0x1534   : > { %v2813_v0 = vpop.f32.mrb[52].mxu1 }
0x1535   : > { %v2814_v1 = vadd.f32 %v3168_v60, %v2813_v0  ;;  %v3638_v3 = vpop.f32.mrb[53].mxu1  ;;  %v2829_v4 = vsel %vm554_vm0, %v2822_v63, 0.0 }
0x1536   : > { %2830 = vadd.xlane.f32.xlu0 %v2829_v4 }
0x1537   : > { %v2823_v5 = vadd.f32 %v2814_v1, %v4630_v28 }
0x1538   : > { %v2818_v7 = vpop.f32.mrb[54].mxu1 }
0x1539   : > { %v2819_v6 = vadd.f32 %v3168_v60, %v2818_v7  ;;  %v3641_v12 = vpop.f32.mrb[55].mxu1  ;;  %v2832_v8 = vsel %vm554_vm0, %v2823_v5, 0.0 }
0x153a   : > { %2833 = vadd.xlane.f32.xlu1 %v2832_v8 }
0x153b   : > { %v2824_v13 = vadd.f32 %v2819_v6, %v4636_v58 }
0x153d   : > { %v2835_v30 = vsel %vm554_vm0, %v2824_v13, 0.0 }
0x153e   : > { %2836 = vadd.xlane.f32.xlu0 %v2835_v30 }
0x15c3   : > { %v2831_v59 = vpop.xlane.xlu0 %2830 }
0x15c4   : > { %v2838_v46 = vmul.f32 0.03125, %v2831_v59 }
0x15c6   : > { %v2841_v14 = vsub.f32 %v2822_v63, %v2838_v46 }
0x15c7   : > { %v2834_v15 = vpop.xlane.xlu1 %2833 }
0x15c8   : > { %v2839_v17 = vmul.f32 0.03125, %v2834_v15  ;;  %v2844_v48 = vmul.f32 %v2841_v14, %v2841_v14 }
0x15ca   : > { %v2842_v18 = vsub.f32 %v2823_v5, %v2839_v17  ;;  %v2847_v28 = vsel %vm554_vm0, %v2844_v48, 0.0 }
0x15cb   : > { %2848 = vadd.xlane.f32.xlu1 %v2847_v28  ;;  %v2837_v35 = vpop.xlane.xlu0 %2836 }
0x15cc   : > { %v2840_v19 = vmul.f32 0.03125, %v2837_v35  ;;  %v2845_v20 = vmul.f32 %v2842_v18, %v2842_v18 }
0x15ce   : > { %v2843_v21 = vsub.f32 %v2824_v13, %v2840_v19  ;;  %v2850_v23 = vsel %vm554_vm0, %v2845_v20, 0.0 }
0x15cf   : > { %2851 = vadd.xlane.f32.xlu0 %v2850_v23 }
0x15d0   : > { %v2846_v58 = vmul.f32 %v2843_v21, %v2843_v21 }
0x15d2   : > { %v2853_v38 = vsel %vm554_vm0, %v2846_v58, 0.0 }
0x15d3   : > { %2854 = vadd.xlane.f32.xlu1 %v2853_v38 }
0x1658   : > { %v2849_v33 = vpop.xlane.xlu1 %2848 }
0x1659   : > { %v2856_v34 = vmul.f32 0.03125, %v2849_v33 }
0x165b   : > { %v2859_v36 = vadd.f32 1e-05, %v2856_v34 }
0x165c   : > { %v2852_v37 = vpop.xlane.xlu0 %2851 }
0x165d   : > { %3922 = vrsqrt.f32 %v2859_v36  ;;  %v2857_v39 = vmul.f32 0.03125, %v2852_v37 }
0x165f   : > { %v2860_v40 = vadd.f32 1e-05, %v2857_v39 }
0x1660   : > { %v2855_v41 = vpop.xlane.xlu1 %2854 }
0x1661   : > { %3924 = vrsqrt.f32 %v2860_v40  ;;  %v2858_v24 = vmul.f32 0.03125, %v2855_v41 }
0x1663   : > { %v2861_v11 = vadd.f32 1e-05, %v2858_v24 }
0x1665   : > { %3926 = vrsqrt.f32 %v2861_v11 }
0x1667   : > { %v3923_v42 = vpop.eup %3922 }
0x1668   : > { %v2865_v43 = vmul.f32 %v3923_v42, %v2841_v14 }
0x166a   : > { %v2874_v47 = vmul.f32 %v3171_v45, %v2865_v43 }
0x166b   : > { %v3925_v50 = vpop.eup %3924 }
0x166c   : > { %v2883_v49 = vadd.f32 %v3172_v44, %v2874_v47  ;;  %v2866_v52 = vmul.f32 %v3925_v50, %v2842_v18 }
0x166e   : > { %3651 = vmatmul.mubr.msk.f32.vlgmr.msra.gmra.mrb[52].mxu0 %vm554_vm0, %v2883_v49  ;;  %v2875_v22 = vmul.f32 %v3171_v45, %v2866_v52 }
0x166f   : > { %v3927_v53 = vpop.eup %3926  ;;  %3653 = vmatprep.mubr.msk.f32.mxu0 %vm3943_vm1, %v3944_v27 }
0x1670   : > { %v2884_v54 = vadd.f32 %v3172_v44, %v2875_v22  ;;  %v2867_v51 = vmul.f32 %v3927_v53, %v2843_v21 }
0x1672   : > { %3654 = vmatmul.mubr.msk.f32.gmra.mrb[54].mxu0 %vm554_vm0, %v2884_v54  ;;  %v2876_v55 = vmul.f32 %v3171_v45, %v2867_v51 }
0x1673   : > { %3656 = vmatprep.mubr.msk.f32.mxu0 %vm3943_vm1, %v3944_v27 }
0x1674   : > { %v2885_v56 = vadd.f32 %v3172_v44, %v2876_v55 }
0x1676   : > { %3657 = vmatmul.mubr.msk.f32.gmra.mrb[56].mxu0 %vm554_vm0, %v2885_v56 }
0x1741   : > { %v2972_v57 = vpop.f32.mrb[52].mxu0 }
0x1742   : > { %v2973_v60 = vadd.f32 %v3173_v61, %v2972_v57  ;;  %v3652_v2 = vpop.f32.mrb[53].mxu0 }
0x1744   : > { %3928 = vtanh.f32 %v2973_v60 }
0x1745   : > { %v2977_v62 = vpop.f32.mrb[54].mxu0 }
0x1746   : > { %v2978_v31 = vadd.f32 %v3173_v61, %v2977_v62  ;;  %v3655_v63 = vpop.f32.mrb[55].mxu0 }
0x1748   : > { %3930 = vtanh.f32 %v2978_v31 }
0x1749   : > { %v2982_v0 = vpop.f32.mrb[56].mxu0 }
0x174a   : > { %v2983_v1 = vadd.f32 %v3173_v61, %v2982_v0  ;;  %v3658_v3 = vpop.f32.mrb[57].mxu0 }
0x174c   : > { %3932 = vtanh.f32 %v2983_v1 }
0x174e   : > { %v3929_v27 = vpop.eup %3928 }
0x174f   : > { %v2990_v4 = vsel %vm2986_vm8, %v3929_v27, %v2973_v60 }
0x1750   : > { %2994 = vst.msk [vmem:[%s548_s0] sm:$0xff] %vm2993_vm9, %v2990_v4 }
0x1752   : > { %v3931_v5 = vpop.eup %3930 }
0x1753   : > { %v2991_v7 = vsel %vm2986_vm8, %v3931_v5, %v2978_v31 }
0x1754   : > { %2995 = vst.msk [vmem:[%s548_s0 + $0x8] sm:$0xff] %vm2993_vm9, %v2991_v7 }
0x1756   : > { %v3933_v6 = vpop.eup %3932 }
0x1757   : > { %v2992_v12 = vsel %vm2986_vm8, %v3933_v6, %v2983_v1 }
0x1758   : > { %2996 = vst.msk [vmem:[%s548_s0 + $0x10] sm:$0xff] %vm2993_vm9, %v2992_v12 }
0x1759 PF: > { %s27_s24 = sadd.s32 1, %s3940_s24  }
0x175a   : > { %p24_p4 = scmp.ge.s32.totalorder %s27_s24, 4  }
0x175c   :  { %26 = sbr.rel (!%p24_p4) target bundleno = 3 (0x3), region = 130 }

</bundles_post_ra>
